<compile_context>
chip_gen: v5e
topology: v5e:2x2
jax: 0.10.0
libtpu: 0.0.40
codegen_flags: <defaults>
</compile_context>

<pallas_src>
import functools
import math

import jax
import jax.numpy as jnp
from jax.experimental import pallas as pl
from jax.experimental.pallas import tpu as pltpu


def _round_up(n, m):
    return ((n + m - 1) // m) * m


def _qnet_kernel(x_ref, w1_ref, w2_ref, o_ref, *, w1_rows, w2_rows):
    # x_ref : (TBR, R*IN)            f32   (R batch rows packed per super-row)
    # w1_ref: (w1_rows + 1, R*H)     bf16, rows [:w1_rows] = block-diag W1^T
    #                                      (zero-padded), row w1_rows = tiled b1
    # w2_ref: (w2_rows + 1, R*OUT)   bf16, rows [:w2_rows] = block-diag W2^T,
    #                                      row w2_rows = tiled b2
    # o_ref : (TBR, R*OUT)           f32   (lane-dense: R*OUT is a mult. of 128)
    x = x_ref[...]

    w1 = w1_ref[:w1_rows, :]                                  # (R*IN_pad, R*H)
    b1 = w1_ref[pl.ds(w1_rows, 1), :].astype(jnp.float32)     # (1, R*H)
    w2 = w2_ref[:w2_rows, :]                                  # (R*H_pad, R*OUT)
    b2 = w2_ref[pl.ds(w2_rows, 1), :].astype(jnp.float32)     # (1, R*OUT)

    # MXU matmuls with bf16 operands, f32 accumulation; elementwise in f32.
    h = jnp.dot(x.astype(w1.dtype), w1,
                preferred_element_type=jnp.float32) + b1
    h = jnp.maximum(h, 0.0)                                   # ReLU (VPU, f32)
    y = jnp.dot(h.astype(w2.dtype), w2,
                preferred_element_type=jnp.float32) + b2
    o_ref[...] = y.astype(o_ref.dtype)


def prepare_params(w1, b1, w2, b2, compute_dtype=jnp.bfloat16, lane_width=128):
    """One-time parameter packing (hoisted out of the per-call hot path).

    PyTorch nn.Linear layout in:  w1 (H, IN), b1 (H,), w2 (OUT, H), b2 (OUT,)

    Packs R = lane_width / gcd(lane_width, OUT) consecutive batch rows into one
    "super-row" by building block-diagonal weights W_big = kron(eye(R), W.T).
    This makes every kernel tile (input, hidden activation, output) lane-dense,
    while the wrapper-side reshapes of x and y stay metadata-only row-major
    views.  Biases are tiled and folded in as a trailing, 16-row-aligned row.

    Returns: (w1_aug, w2_aug, pack, out_size)
      w1_aug: (round_up(R*IN,16)+1, R*H)    compute_dtype
      w2_aug: (round_up(R*H,16)+1, R*OUT)   compute_dtype   (R*OUT % 128 == 0)
    """
    w1 = jnp.asarray(w1, jnp.float32)
    b1 = jnp.asarray(b1, jnp.float32)
    w2 = jnp.asarray(w2, jnp.float32)
    b2 = jnp.asarray(b2, jnp.float32)
    H, IN = w1.shape
    OUT, H2 = w2.shape
    assert H2 == H and b1.shape == (H,) and b2.shape == (OUT,)

    R = lane_width // math.gcd(lane_width, OUT)   # smallest R with R*OUT % 128 == 0
    eye = jnp.eye(R, dtype=jnp.float32)
    w1_big = jnp.kron(eye, w1.T)                  # (R*IN, R*H)  block-diagonal
    w2_big = jnp.kron(eye, w2.T)                  # (R*H, R*OUT) block-diagonal
    b1_big = jnp.tile(b1, R)                      # (R*H,)
    b2_big = jnp.tile(b2, R)                      # (R*OUT,)

    k1 = _round_up(R * IN, 16)                    # 16-row aligned (bf16 packing)
    k2 = _round_up(R * H, 16)
    w1_aug = jnp.zeros((k1 + 1, R * H), jnp.float32)
    w1_aug = w1_aug.at[:R * IN, :].set(w1_big).at[k1, :].set(b1_big)
    w2_aug = jnp.zeros((k2 + 1, R * OUT), jnp.float32)
    w2_aug = w2_aug.at[:R * H, :].set(w2_big).at[k2, :].set(b2_big)
    return w1_aug.astype(compute_dtype), w2_aug.astype(compute_dtype), R, OUT


@functools.partial(jax.jit, static_argnames=("pack", "out_size", "block_rows"))
def linear_qnet_forward(x, w1_aug, w2_aug, pack, out_size, block_rows=8192):
    """x: (B, IN) f32; (w1_aug, w2_aug, pack, out_size) from prepare_params."""
    B, IN = x.shape
    R = pack
    n1 = w1_aug.shape[1]            # R*H
    n2 = w2_aug.shape[1]            # R*OUT (multiple of 128 -> lane-dense)
    w1_rows = w1_aug.shape[0] - 1
    w2_rows = w2_aug.shape[0] - 1

    # Row tiling: tb original rows per grid step (multiple of 8*R so the packed
    # block's sublane dim is a multiple of 8).  Batch padded to a multiple of
    # tb -> no single-block fallback, every B takes the pipelined tiled path.
    row_align = 8 * R
    num_blocks = max(1, pl.cdiv(B, block_rows))
    tb = _round_up(pl.cdiv(B, num_blocks), row_align)
    b_pad = tb * num_blocks
    tbr = tb // R

    xp = x if b_pad == B else jnp.pad(x, ((0, b_pad - B), (0, 0)))
    xr = xp.reshape(b_pad // R, R * IN)      # metadata-only row-major view

    kernel = functools.partial(_qnet_kernel, w1_rows=w1_rows, w2_rows=w2_rows)

    flops = 2 * (b_pad // R) * (w1_rows * n1 + w2_rows * n2)
    bytes_accessed = (xr.size * xr.dtype.itemsize
                      + w1_aug.size * w1_aug.dtype.itemsize
                      + w2_aug.size * w2_aug.dtype.itemsize
                      + (b_pad // R) * n2 * 4)

    y_slab = pl.pallas_call(
        kernel,
        out_shape=jax.ShapeDtypeStruct((b_pad // R, n2), jnp.float32),
        grid=(num_blocks,),
        in_specs=[
            pl.BlockSpec((tbr, R * IN), lambda i: (i, 0)),        # x row tile
            pl.BlockSpec((w1_rows + 1, n1), lambda i: (0, 0)),    # resident W1+b1
            pl.BlockSpec((w2_rows + 1, n2), lambda i: (0, 0)),    # resident W2+b2
        ],
        out_specs=pl.BlockSpec((tbr, n2), lambda i: (i, 0)),      # lane-dense
        # "parallel" lets v7x's two TensorCores split the batch axis; if xprof
        # shows no split, switch to pltpu.CORE_PARALLEL (no effect on v5e/v6e).
        compiler_params=pltpu.CompilerParams(
            dimension_semantics=("parallel",)),
        cost_estimate=pl.CostEstimate(
            flops=flops, transcendentals=0, bytes_accessed=bytes_accessed),
    )(xr, w1_aug, w2_aug)

    y = y_slab.reshape(b_pad, out_size)      # metadata-only row-major view
    return y if b_pad == B else y[:B]


def init_params(key, input_size, hidden_size, output_size):
    """Deterministic init mimicking nn.Linear's U(-1/sqrt(fan_in), 1/sqrt(fan_in))."""
    k1, k2, k3, k4 = jax.random.split(key, 4)
    bound1 = 1.0 / (input_size ** 0.5)
    bound2 = 1.0 / (hidden_size ** 0.5)
    w1 = jax.random.uniform(k1, (hidden_size, input_size), jnp.float32, -bound1, bound1)
    b1 = jax.random.uniform(k2, (hidden_size,), jnp.float32, -bound1, bound1)
    w2 = jax.random.uniform(k3, (output_size, hidden_size), jnp.float32, -bound2, bound2)
    b2 = jax.random.uniform(k4, (output_size,), jnp.float32, -bound2, bound2)
    return w1, b1, w2, b2


def reference_forward(x, w1, b1, w2, b2, compute_dtype=jnp.bfloat16):
    """f32 reference using the same bf16-rounded params/activations as the kernel."""
    q = lambda a: a.astype(compute_dtype).astype(jnp.float32)
    h = jnp.maximum(q(x) @ q(w1.T) + q(b1), 0.0)
    return q(h) @ q(w2.T) + q(b2)


# TODO(synk): Linear_QNet.save (torch.save of the state_dict) is host-side
# file I/O with no Pallas equivalent; parameter persistence is out of scope.


if __name__ == "__main__":
    key = jax.random.PRNGKey(0)
    kx, kp, kb = jax.random.split(key, 3)

    # Small shapes consistent with the module: Linear_QNet(input, hidden, output)
    batch, input_size, hidden_size, output_size = 2, 16, 32, 4

    x = jax.random.normal(kx, (batch, input_size), jnp.float32)
    w1, b1, w2, b2 = init_params(kp, input_size, hidden_size, output_size)

    # One-time packing (block-diag transpose + bias fold + bf16 cast) — NOT per call.
    w1_aug, w2_aug, pack, out_size = prepare_params(w1, b1, w2, b2)

    # Small-batch inference path (single grid step after padding to the row tile).
    out = jax.block_until_ready(
        linear_qnet_forward(x, w1_aug, w2_aug, pack, out_size))
    assert out.shape == (batch, output_size)

    # Check vs. a reference using the same bf16-rounded params/activations.
    # Tolerance 5e-3: MXU vs XLA accumulation order can flip a rare bf16
    # rounding of the hidden activation (~1e-3 effect on an output element).
    ref_q = reference_forward(x, w1, b1, w2, b2)
    assert jnp.allclose(out, ref_q, atol=5e-3, rtol=5e-3)
    # Fidelity vs. the pure-f32 PyTorch-style forward (bf16 quantization noise only).
    ref_f32 = jnp.maximum(x @ w1.T + b1, 0.0) @ w2.T + b2
    assert jnp.allclose(out, ref_f32, atol=5e-2, rtol=5e-2)

    # Larger batches: exercises padding (non-multiple of the row alignment) and
    # the multi-step "parallel" grid (B=20000 -> 3 grid steps at block_rows=8192).
    for bb in (512, 1000, 20000):
        xb = jax.random.normal(kb, (bb, input_size), jnp.float32)
        ob = jax.block_until_ready(
            linear_qnet_forward(xb, w1_aug, w2_aug, pack, out_size))
        rb = reference_forward(xb, w1, b1, w2, b2)
        assert ob.shape == (bb, output_size)
        assert jnp.allclose(ob, rb, atol=5e-3, rtol=5e-3), bb

    print("KERNEL_OK")
</pallas_src>

<mosaic_0001>
module attributes {stable_mosaic.version = 11 : i64} {
  func.func @_qnet_kernel(%arg0: i32, %arg1: memref<8x512xf32, #tpu.memory_space<vmem>>, %arg2: memref<513x1024xbf16, #tpu.memory_space<vmem>>, %arg3: memref<1025x128xbf16, #tpu.memory_space<vmem>>, %arg4: memref<8x128xf32, #tpu.memory_space<vmem>>) attributes {dimension_semantics = [#tpu.dimension_semantics<parallel>], iteration_bounds = array<i64: 1>, scalar_prefetch = 0 : i64, scratch_operands = 0 : i64, tpu.core_type = #tpu.core_type<tc>, window_params = [{transform_indices = @transform_0, window_bounds = array<i64: 8, 512>}, {pipeline_mode = #tpu.pipeline_mode<synchronous>, transform_indices = @transform_1, window_bounds = array<i64: 513, 1024>}, {pipeline_mode = #tpu.pipeline_mode<synchronous>, transform_indices = @transform_2, window_bounds = array<i64: 1025, 128>}, {transform_indices = @transform_3, window_bounds = array<i64: 8, 128>}]} {
    %c0 = arith.constant 0 : index
    %c0_0 = arith.constant 0 : index
    %0 = vector.load %arg1[%c0, %c0_0] : memref<8x512xf32, #tpu.memory_space<vmem>>, vector<8x512xf32>
    %c0_1 = arith.constant 0 : index
    %c0_2 = arith.constant 0 : index
    %1 = vector.load %arg2[%c0_1, %c0_2] : memref<513x1024xbf16, #tpu.memory_space<vmem>>, vector<512x1024xbf16>
    %c512 = arith.constant 512 : index
    %c0_3 = arith.constant 0 : index
    %2 = vector.load %arg2[%c512, %c0_3] : memref<513x1024xbf16, #tpu.memory_space<vmem>>, vector<1x1024xbf16>
    %3 = arith.extf %2 : vector<1x1024xbf16> to vector<1x1024xf32>
    %c0_4 = arith.constant 0 : index
    %c0_5 = arith.constant 0 : index
    %4 = vector.load %arg3[%c0_4, %c0_5] : memref<1025x128xbf16, #tpu.memory_space<vmem>>, vector<1024x128xbf16>
    %c1024 = arith.constant 1024 : index
    %c0_6 = arith.constant 0 : index
    %5 = vector.load %arg3[%c1024, %c0_6] : memref<1025x128xbf16, #tpu.memory_space<vmem>>, vector<1x128xbf16>
    %6 = arith.extf %5 : vector<1x128xbf16> to vector<1x128xf32>
    %7 = arith.truncf %0 : vector<8x512xf32> to vector<8x512xbf16>
    %cst = arith.constant dense<0.000000e+00> : vector<8x1024xf32>
    %8 = tpu.matmul %7, %1, %cst {dimension_numbers = #tpu.dot_dimension_numbers<[1], [0], [0], [1], [0, 0, 1, 1], [], []>} : vector<8x512xbf16>, vector<512x1024xbf16>, vector<8x1024xf32> -> vector<8x1024xf32>
    %9 = vector.broadcast %3 : vector<1x1024xf32> to vector<8x1024xf32>
    %10 = arith.addf %8, %9 : vector<8x1024xf32>
    %cst_7 = arith.constant 0.000000e+00 : f32
    %11 = vector.broadcast %cst_7 : f32 to vector<8x1024xf32>
    %12 = arith.maximumf %10, %11 : vector<8x1024xf32>
    %13 = arith.truncf %12 : vector<8x1024xf32> to vector<8x1024xbf16>
    %cst_8 = arith.constant dense<0.000000e+00> : vector<8x128xf32>
    %14 = tpu.matmul %13, %4, %cst_8 {dimension_numbers = #tpu.dot_dimension_numbers<[1], [0], [0], [1], [0, 0, 1, 1], [], []>} : vector<8x1024xbf16>, vector<1024x128xbf16>, vector<8x128xf32> -> vector<8x128xf32>
    %15 = vector.broadcast %6 : vector<1x128xf32> to vector<8x128xf32>
    %16 = arith.addf %14, %15 : vector<8x128xf32>
    %c0_9 = arith.constant 0 : index
    %c0_10 = arith.constant 0 : index
    %17 = vector.load %arg4[%c0_9, %c0_10] : memref<8x128xf32, #tpu.memory_space<vmem>>, vector<8x128xf32>
    tpu.vector_store %arg4[%c0_9, %c0_10], %16 {strides = array<i32>} : memref<8x128xf32, #tpu.memory_space<vmem>>, vector<8x128xf32>,
    return
  }
  func.func @transform_0(%arg0: i32) -> (i32, i32) {
    %c0_i32 = arith.constant 0 : i32
    %c0_i32_0 = arith.constant 0 : i32
    return %arg0, %c0_i32 : i32, i32
  }
  func.func @transform_1(%arg0: i32) -> (i32, i32) {
    %c0_i32 = arith.constant 0 : i32
    %c0_i32_0 = arith.constant 0 : i32
    %c0_i32_1 = arith.constant 0 : i32
    return %c0_i32, %c0_i32_0 : i32, i32
  }
  func.func @transform_2(%arg0: i32) -> (i32, i32) {
    %c0_i32 = arith.constant 0 : i32
    %c0_i32_0 = arith.constant 0 : i32
    %c0_i32_1 = arith.constant 0 : i32
    return %c0_i32, %c0_i32_0 : i32, i32
  }
  func.func @transform_3(%arg0: i32) -> (i32, i32) {
    %c0_i32 = arith.constant 0 : i32
    %c0_i32_0 = arith.constant 0 : i32
    return %arg0, %c0_i32 : i32, i32
  }
}

</mosaic_0001>

<bundles_post_ra>
// kernel: linear_qnet_forward.1
= control target key start
LH: loop header
LB: loop body
LE: loop exit
PB: predicated region body
PF: predicated region fallthrough
CT: control target
= control target key end

     0   :  { %8 = vsyncpa [#allocation3], 0  ;;  %s4439_s0 = inlined_call_operand.vmem [shape: f32[8,512], index: 0, kind: input, shape index: {}]   ;;  %s4440_s1 = inlined_call_operand.hbm [shape: bf16[513,1024], index: 1, kind: input, shape index: {}]   ;;  %s4441_s2 = inlined_call_operand.hbm [shape: bf16[1025,128], index: 2, kind: input, shape index: {}]   ;;  %s4442_s3 = inlined_call_operand.vmem [shape: f32[8,128], index: 3, kind: output, shape index: {}]  }
   0x1   :  { %s16_s14 = sshll.u32 %s4440_s1, 4  ;;  %s17_s14 = int_to_ptr.hbm [resolvable:$true] %s16_s14 }
   0x2   :  { %9 = vsyncpa [#allocation5], 0  ;;  %s4326_s15 = smov [#allocation2]   ;;  %s29_s19 = sshll.u32 %s4441_s2, 4  ;;  %s30_s19 = int_to_ptr.hbm [resolvable:$true] %s29_s19 }
   0x3   :  { %s18_s16 = sshll.u32 %s4326_s15, 4  ;;  %s4327_s20 = smov 512   ;;  %s19_s16 = int_to_ptr.vmem [resolvable:$true] %s18_s16 }
   0x4   :  { %s4328_s21 = smov 32   ;;  %s4329_s22 = smov [#allocation4]  }
   0x5   :  { %24 = dma.hbm_to_vmem [thread:$0]  %s17_s14, 33280, %s19_s16, [#allocation3], %s4327_s20, %s4327_s20, %s4328_s21  }
   0x6   :  { %s31_s23 = sshll.u32 %s4329_s22, 4  ;;  %s4330_s24 = smov 64   ;;  %s32_s23 = int_to_ptr.vmem [resolvable:$true] %s31_s23 }
   0x7   :  { %s4331_s25 = smov 4  }
   0x8   :  { %37 = dma.hbm_to_vmem [thread:$0]  %s30_s19, 8256, %s32_s23, [#allocation5], %s4330_s24, %s4330_s24, %s4331_s25  }
   0x9   :  { %4322 = dma.done.wait [#allocation3], 33280  }
   0xa   :  { %4323 = vsyncadd [#allocation3], 4294934016 }
   0xb   :  { %4324 = dma.done.wait [#allocation5], 8256  }
   0xc   :  { %4325 = vsyncadd [#allocation5], 4294959040  ;;  %v2894_v0 = vld [vmem:[#allocation2 + $0x1c0] sm:$0xf] }
   0xd   :  { %v4008_v1 = vld [vmem:[#allocation2 + $0x1dc] sm:$0xf0] }
   0xe   :  { %v3150_v2 = vld [vmem:[#allocation2 + $0x3c0] sm:$0xf]  ;;  %v2895_v3 = vor.u32 %v4008_v1, %v2894_v0 }
   0xf   :  { %v4072_v4 = vld [vmem:[#allocation2 + $0x3dc] sm:$0xf0] }
  0x10   :  { %v3406_v5 = vld [vmem:[#allocation2 + $0x5c0] sm:$0xf]  ;;  %v3151_v7 = vor.u32 %v4072_v4, %v3150_v2  ;;  %1740 = vmatpush.bf16.msra.mxu0 %v2895_v3 }
  0x11   :  { %v4136_v6 = vld [vmem:[#allocation2 + $0x5dc] sm:$0xf0] }
  0x12   :  { %v3407_v8 = vor.u32 %v4136_v6, %v3406_v5  ;;  %v3662_v9 = vld [vmem:[#allocation2 + $0x7c0] sm:$0xf]  ;;  %1753 = vmatpush.bf16.msra.mxu1 %v3151_v7 }
  0x13   :  { %v4200_v10 = vld [vmem:[#allocation2 + $0x7dc] sm:$0xf0] }
  0x14   :  { %v2862_v11 = vld [vmem:[#allocation2 + $0x180] sm:$0xf]  ;;  %v3663_v12 = vor.u32 %v4200_v10, %v3662_v9  ;;  %1766 = vmatpush.bf16.msra.mxu2 %v3407_v8 }
  0x15   :  { %v4000_v13 = vld [vmem:[#allocation2 + $0x19c] sm:$0xf0] }
  0x16   :  { %v3118_v14 = vld [vmem:[#allocation2 + $0x380] sm:$0xf]  ;;  %v2863_v16 = vor.u32 %v4000_v13, %v2862_v11  ;;  %1779 = vmatpush.bf16.msra.mxu3 %v3663_v12 }
  0x17   :  { %v4064_v15 = vld [vmem:[#allocation2 + $0x39c] sm:$0xf0] }
  0x18   :  { %v3119_v17 = vor.u32 %v4064_v15, %v3118_v14  ;;  %v3374_v18 = vld [vmem:[#allocation2 + $0x580] sm:$0xf]  ;;  %1741 = vmatpush.bf16.msra.mxu0 %v2863_v16 }
  0x19   :  { %v4128_v19 = vld [vmem:[#allocation2 + $0x59c] sm:$0xf0] }
  0x1a   :  { %v3630_v20 = vld [vmem:[#allocation2 + $0x780] sm:$0xf]  ;;  %v3375_v21 = vor.u32 %v4128_v19, %v3374_v18  ;;  %1754 = vmatpush.bf16.msra.mxu1 %v3119_v17 }
  0x1b   :  { %v4192_v22 = vld [vmem:[#allocation2 + $0x79c] sm:$0xf0] }
  0x1c   :  { %v2830_v23 = vld [vmem:[#allocation2 + $0x140] sm:$0xf]  ;;  %v3631_v25 = vor.u32 %v4192_v22, %v3630_v20  ;;  %1767 = vmatpush.bf16.msra.mxu2 %v3375_v21 }
  0x1d   :  { %v3992_v24 = vld [vmem:[#allocation2 + $0x15c] sm:$0xf0] }
  0x1e   :  { %v3086_v26 = vld [vmem:[#allocation2 + $0x340] sm:$0xf]  ;;  %v2831_v29 = vor.u32 %v3992_v24, %v2830_v23  ;;  %1780 = vmatpush.bf16.msra.mxu3 %v3631_v25 }
  0x1f   :  { %v4056_v27 = vld [vmem:[#allocation2 + $0x35c] sm:$0xf0] }
  0x20   :  { %v3342_v28 = vld [vmem:[#allocation2 + $0x540] sm:$0xf]  ;;  %v3087_v33 = vor.u32 %v4056_v27, %v3086_v26  ;;  %1742 = vmatpush.bf16.msra.mxu0 %v2831_v29  ;;  %v2896_v29 = vld [vmem:[#allocation2 + $0x1e0] sm:$0xf0] }
  0x21   :  { %v4120_v30 = vld [vmem:[#allocation2 + $0x55c] sm:$0xf0] }
  0x22   :  { %v3598_v31 = vld [vmem:[#allocation2 + $0x740] sm:$0xf]  ;;  %v3343_v34 = vor.u32 %v4120_v30, %v3342_v28  ;;  %1755 = vmatpush.bf16.msra.mxu1 %v3087_v33  ;;  %v4004_v28 = vld [vmem:[#allocation2 + $0x1c4] sm:$0xf] }
  0x23   :  { %v4184_v32 = vld [vmem:[#allocation2 + $0x75c] sm:$0xf0]  ;;  %v4068_v30 = vld [vmem:[#allocation2 + $0x3c4] sm:$0xf] }
  0x24   :  { %v2798_v35 = vld [vmem:[#allocation2 + $0x100] sm:$0xf]  ;;  %v3599_v38 = vor.u32 %v4184_v32, %v3598_v31  ;;  %1768 = vmatpush.bf16.msra.mxu2 %v3343_v34  ;;  %v3152_v32 = vld [vmem:[#allocation2 + $0x3e0] sm:$0xf0] }
  0x25   :  { %v3984_v36 = vld [vmem:[#allocation2 + $0x11c] sm:$0xf0]  ;;  %v4132_v33 = vld [vmem:[#allocation2 + $0x5c4] sm:$0xf] }
  0x26   :  { %v3054_v37 = vld [vmem:[#allocation2 + $0x300] sm:$0xf]  ;;  %v2799_v44 = vor.u32 %v3984_v36, %v2798_v35  ;;  %1781 = vmatpush.bf16.msra.mxu3 %v3599_v38  ;;  %v3408_v34 = vld [vmem:[#allocation2 + $0x5e0] sm:$0xf0] }
  0x27   :  { %v4048_v39 = vld [vmem:[#allocation2 + $0x31c] sm:$0xf0]  ;;  %v3664_v38 = vld [vmem:[#allocation2 + $0x7e0] sm:$0xf0] }
  0x28   :  { %v3310_v40 = vld [vmem:[#allocation2 + $0x500] sm:$0xf]  ;;  %v3055_v45 = vor.u32 %v4048_v39, %v3054_v37  ;;  %1743 = vmatpush.bf16.msra.mxu0 %v2799_v44  ;;  %v4196_v37 = vld [vmem:[#allocation2 + $0x7c4] sm:$0xf] }
  0x29   :  { %v4112_v41 = vld [vmem:[#allocation2 + $0x51c] sm:$0xf0]  ;;  %v2864_v44 = vld [vmem:[#allocation2 + $0x1a0] sm:$0xf0] }
  0x2a   :  { %v3566_v42 = vld [vmem:[#allocation2 + $0x700] sm:$0xf]  ;;  %v3311_v46 = vor.u32 %v4112_v41, %v3310_v40  ;;  %1756 = vmatpush.bf16.msra.mxu1 %v3055_v45  ;;  %v2899_v40 = vor.u32 %v4004_v28, %v2896_v29  ;;  %v3155_v41 = vor.u32 %v4068_v30, %v3152_v32  ;;  %v4060_v45 = vld [vmem:[#allocation2 + $0x384] sm:$0xf] }
  0x2b   :  { %v4176_v43 = vld [vmem:[#allocation2 + $0x71c] sm:$0xf0]  ;;  %v4100_v28 = vld [vmem:[#allocation2 + $0x4c4] sm:$0xf] }
  0x2c   :  { %v2766_v47 = vld [vmem:[#allocation2 + $0xc0] sm:$0xf]  ;;  %v3567_v50 = vor.u32 %v4176_v43, %v3566_v42  ;;  %1769 = vmatpush.bf16.msra.mxu2 %v3311_v46  ;;  %v3411_v42 = vor.u32 %v4132_v33, %v3408_v34  ;;  %v3996_v43 = vld [vmem:[#allocation2 + $0x184] sm:$0xf]  ;;  %v3667_v46 = vor.u32 %v4196_v37, %v3664_v38 }
  0x2d   :  { %v3976_v48 = vld [vmem:[#allocation2 + $0xdc] sm:$0xf0]  ;;  %v3280_v29 = vld [vmem:[#allocation2 + $0x4e0] sm:$0xf0] }
  0x2e   :  { %v3022_v49 = vld [vmem:[#allocation2 + $0x2c0] sm:$0xf]  ;;  %v2767_v56 = vor.u32 %v3976_v48, %v2766_v47  ;;  %1782 = vmatpush.bf16.msra.mxu3 %v3567_v50  ;;  %v3120_v47 = vld [vmem:[#allocation2 + $0x3a0] sm:$0xf0]  ;;  %v3283_v34 = vor.u32 %v4100_v28, %v3280_v29  ;;  %v3382_v28 = vld [vmem:[#allocation2 + $0x588] sm:$0xf] }
  0x2f   :  { %v4040_v51 = vld [vmem:[#allocation2 + $0x2dc] sm:$0xf0]  ;;  %v4124_v48 = vld [vmem:[#allocation2 + $0x584] sm:$0xf]  ;;  %v4129_v29 = vld [vmem:[#allocation2 + $0x5a4] sm:$0xf0] }
  0x30   :  { %v3278_v52 = vld [vmem:[#allocation2 + $0x4c0] sm:$0xf]  ;;  %v3023_v57 = vor.u32 %v4040_v51, %v3022_v49  ;;  %1744 = vmatpush.bf16.msra.mxu0 %v2767_v56  ;;  %v3376_v49 = vld [vmem:[#allocation2 + $0x5a0] sm:$0xf0] }
  0x31   :  { %v4104_v53 = vld [vmem:[#allocation2 + $0x4dc] sm:$0xf0]  ;;  %v4188_v50 = vld [vmem:[#allocation2 + $0x784] sm:$0xf] }
  0x32   :  { %v3534_v54 = vld [vmem:[#allocation2 + $0x6c0] sm:$0xf]  ;;  %v3279_v58 = vor.u32 %v4104_v53, %v3278_v52  ;;  %1757 = vmatpush.bf16.msra.mxu1 %v3023_v57  ;;  %v3632_v51 = vld [vmem:[#allocation2 + $0x7a0] sm:$0xf0]  ;;  %v2867_v52 = vor.u32 %v3996_v43, %v2864_v44 }
  0x33   :  { %v4168_v55 = vld [vmem:[#allocation2 + $0x6dc] sm:$0xf0]  ;;  %v3988_v53 = vld [vmem:[#allocation2 + $0x144] sm:$0xf] }
  0x34   :  { %v2734_v59 = vld [vmem:[#allocation2 + $0x80] sm:$0xf]  ;;  %v3535_v62 = vor.u32 %v4168_v55, %v3534_v54  ;;  %1770 = vmatpush.bf16.msra.mxu2 %v3279_v58  ;;  %v3123_v54 = vor.u32 %v4060_v45, %v3120_v47  ;;  %v3379_v55 = vor.u32 %v4124_v48, %v3376_v49  ;;  %v2832_v56 = vld [vmem:[#allocation2 + $0x160] sm:$0xf0] }
  0x35   :  { %v3968_v60 = vld [vmem:[#allocation2 + $0x9c] sm:$0xf0]  ;;  %v4052_v57 = vld [vmem:[#allocation2 + $0x344] sm:$0xf] }
  0x36   :  { %v2990_v61 = vld [vmem:[#allocation2 + $0x280] sm:$0xf]  ;;  %v2735_v4 = vor.u32 %v3968_v60, %v2734_v59  ;;  %1783 = vmatpush.bf16.msra.mxu3 %v3535_v62  ;;  %v3088_v58 = vld [vmem:[#allocation2 + $0x360] sm:$0xf0]  ;;  %v3635_v59 = vor.u32 %v4188_v50, %v3632_v51 }
  0x37   :  { %v4032_v63 = vld [vmem:[#allocation2 + $0x29c] sm:$0xf0]  ;;  %v4116_v60 = vld [vmem:[#allocation2 + $0x544] sm:$0xf] }
  0x38   :  { %v3246_v0 = vld [vmem:[#allocation2 + $0x480] sm:$0xf]  ;;  %v2991_v5 = vor.u32 %v4032_v63, %v2990_v61  ;;  %1745 = vmatpush.bf16.msra.mxu0 %v2735_v4  ;;  %v3344_v61 = vld [vmem:[#allocation2 + $0x560] sm:$0xf0] }
  0x39   :  { %v4096_v1 = vld [vmem:[#allocation2 + $0x49c] sm:$0xf0]  ;;  %v4180_v62 = vld [vmem:[#allocation2 + $0x744] sm:$0xf] }
  0x3a   :  { %v3502_v2 = vld [vmem:[#allocation2 + $0x680] sm:$0xf]  ;;  %v3247_v6 = vor.u32 %v4096_v1, %v3246_v0  ;;  %1758 = vmatpush.bf16.msra.mxu1 %v2991_v5  ;;  %v3600_v63 = vld [vmem:[#allocation2 + $0x760] sm:$0xf0]  ;;  %v2835_v0 = vor.u32 %v3988_v53, %v2832_v56  ;;  %v3091_v1 = vor.u32 %v4052_v57, %v3088_v58  ;;  %v3347_v5 = vor.u32 %v4116_v60, %v3344_v61 }
  0x3b   :  { %v4160_v3 = vld [vmem:[#allocation2 + $0x69c] sm:$0xf0]  ;;  %v4164_v30 = vld [vmem:[#allocation2 + $0x6c4] sm:$0xf] }
  0x3c   :  { %v2702_v7 = vld [vmem:[#allocation2 + $0x40] sm:$0xf]  ;;  %v3503_v10 = vor.u32 %v4160_v3, %v3502_v2  ;;  %1771 = vmatpush.bf16.msra.mxu2 %v3247_v6  ;;  %v3980_v2 = vld [vmem:[#allocation2 + $0x104] sm:$0xf]  ;;  %v48_v3 = vld [vmem:[%s4439_s0 + $0x10] sm:$0xff] }
  0x3d   :  { %v3960_v8 = vld [vmem:[#allocation2 + $0x5c] sm:$0xf0]  ;;  %v2800_v6 = vld [vmem:[#allocation2 + $0x120] sm:$0xf0] }
  0x3e   :  { %v2958_v9 = vld [vmem:[#allocation2 + $0x240] sm:$0xf]  ;;  %v2703_v16 = vor.u32 %v3960_v8, %v2702_v7  ;;  %1784 = vmatpush.bf16.msra.mxu3 %v3503_v10  ;;  %v4044_v7 = vld [vmem:[#allocation2 + $0x304] sm:$0xf]  ;;  %v4364_v8 = vpack.c.bf16 %v48_v3, %v48_v3  ;;  %v49_v10 = vld [vmem:[%s4439_s0 + $0x18] sm:$0xff] }
  0x3f   :  { %v4024_v11 = vld [vmem:[#allocation2 + $0x25c] sm:$0xf0]  ;;  %v4028_v37 = vld [vmem:[#allocation2 + $0x284] sm:$0xf] }
  0x40   :  { %v3214_v12 = vld [vmem:[#allocation2 + $0x440] sm:$0xf]  ;;  %v2959_v19 = vor.u32 %v4024_v11, %v2958_v9  ;;  %1746 = vmatpush.bf16.msra.mxu0 %v2703_v16  ;;  %v3603_v11 = vor.u32 %v4180_v62, %v3600_v63  ;;  %v4172_v16 = vld [vmem:[#allocation2 + $0x704] sm:$0xf] }
  0x41   :  { %v4088_v13 = vld [vmem:[#allocation2 + $0x45c] sm:$0xf0]  ;;  %v3504_v43 = vld [vmem:[#allocation2 + $0x6a0] sm:$0xf0] }
  0x42   :  { %v3470_v14 = vld [vmem:[#allocation2 + $0x640] sm:$0xf]  ;;  %v3215_v20 = vor.u32 %v4088_v13, %v3214_v12  ;;  %1759 = vmatpush.bf16.msra.mxu1 %v2959_v19  ;;  %v3056_v12 = vld [vmem:[#allocation2 + $0x320] sm:$0xf0]  ;;  %v47_v19 = vld [vmem:[%s4439_s0 + $0x8] sm:$0xff] }
  0x43   :  { %v4152_v15 = vld [vmem:[#allocation2 + $0x65c] sm:$0xf0]  ;;  %v4108_v13 = vld [vmem:[#allocation2 + $0x504] sm:$0xf] }
  0x44   :  { %v2670_v17 = vld [vmem:[#allocation2] sm:$0xf]  ;;  %v3471_v24 = vor.u32 %v4152_v15, %v3470_v14  ;;  %1772 = vmatpush.bf16.msra.mxu2 %v3215_v20  ;;  %v3312_v14 = vld [vmem:[#allocation2 + $0x520] sm:$0xf0]  ;;  %v4371_v15 = vpack.c.bf16 %v49_v10, %v49_v10  ;;  %v3059_v20 = vor.u32 %v4044_v7, %v3056_v12  ;;  %v4073_v10 = vld [vmem:[#allocation2 + $0x3e4] sm:$0xf0] }
  0x45   :  { %v3952_v18 = vld [vmem:[#allocation2 + $0x1c] sm:$0xf0]  ;;  %v3956_v47 = vld [vmem:[#allocation2 + $0x44] sm:$0xf]  ;;  %v4137_v12 = vld [vmem:[#allocation2 + $0x5e4] sm:$0xf0] }
  0x46   :  { %v2926_v21 = vld [vmem:[#allocation2 + $0x200] sm:$0xf]  ;;  %v2671_v31 = vor.u32 %v3952_v18, %v2670_v17  ;;  %1785 = vmatpush.bf16.msra.mxu3 %v3471_v24  ;;  %v3568_v17 = vld [vmem:[#allocation2 + $0x720] sm:$0xf0]  ;;  %v2803_v18 = vor.u32 %v3980_v2, %v2800_v6  ;;  %v3158_v6 = vld [vmem:[#allocation2 + $0x3c8] sm:$0xf] }
  0x47   :  { %v4016_v22 = vld [vmem:[#allocation2 + $0x21c] sm:$0xf0]  ;;  %v4036_v24 = vld [vmem:[#allocation2 + $0x2c4] sm:$0xf] }
  0x48   :  { %v3182_v23 = vld [vmem:[#allocation2 + $0x400] sm:$0xf]  ;;  %v2927_v35 = vor.u32 %v4016_v22, %v2926_v21  ;;  %1747 = vmatpush.bf16.msra.mxu0 %v2671_v31  ;;  %v3315_v21 = vor.u32 %v4108_v13, %v3312_v14  ;;  %v3972_v22 = vld [vmem:[#allocation2 + $0xc4] sm:$0xf] }
  0x49   :  { %v4080_v25 = vld [vmem:[#allocation2 + $0x41c] sm:$0xf0]  ;;  %v3536_v31 = vld [vmem:[#allocation2 + $0x6e0] sm:$0xf0] }
  0x4a   :  { %v3438_v26 = vld [vmem:[#allocation2 + $0x600] sm:$0xf]  ;;  %v3183_v36 = vor.u32 %v4080_v25, %v3182_v23  ;;  %1760 = vmatpush.bf16.msra.mxu1 %v2927_v35  ;;  %v2768_v23 = vld [vmem:[#allocation2 + $0xe0] sm:$0xf0]  ;;  %v4379_v25 = vpack.c.bf16 %v47_v19, %v47_v19  ;;  %v3539_v38 = vor.u32 %v4164_v30, %v3536_v31  ;;  %v3638_v30 = vld [vmem:[#allocation2 + $0x788] sm:$0xf] }
  0x4b   :  { %v4144_v27 = vld [vmem:[#allocation2 + $0x61c] sm:$0xf0]  ;;  %v2771_v32 = vor.u32 %v3972_v22, %v2768_v23  ;;  %v3964_v35 = vld [vmem:[#allocation2 + $0x84] sm:$0xf]  ;;  %v2870_v22 = vld [vmem:[#allocation2 + $0x188] sm:$0xf] }
  0x4c   :  { %v3439_v39 = vor.u32 %v4144_v27, %v3438_v26  ;;  %1773 = vmatpush.bf16.msra.mxu2 %v3183_v36  ;;  %1792 = vmatpush.bf16.msrb.mxu0 %v2899_v40  ;;  %v46_v4 = vld [vmem:[%s4439_s0] sm:$0xff]  ;;  %v3571_v26 = vor.u32 %v4172_v16, %v3568_v17  ;;  %v3670_v16 = vld [vmem:[#allocation2 + $0x7c8] sm:$0xf] }
  0x4d   :  { %v4366_v9 = vpack.c.bf16 %v46_v4, %v46_v4  ;;  %v3024_v27 = vld [vmem:[#allocation2 + $0x2e0] sm:$0xf0]  ;;  %1761 = vmatmul.bf16.vlgmr.msra.gmra.mxu1 %v4379_v25  ;;  %v2902_v4 = vld [vmem:[#allocation2 + $0x1c8] sm:$0xf] }
  0x4e   :  { %1786 = vmatpush.bf16.msra.mxu3 %v3439_v39  ;;  %1805 = vmatpush.bf16.msrb.mxu1 %v3155_v41  ;;  %v3027_v33 = vor.u32 %v4036_v24, %v3024_v27  ;;  %v2736_v36 = vld [vmem:[#allocation2 + $0xa0] sm:$0xf0]  ;;  %v4201_v17 = vld [vmem:[#allocation2 + $0x7e4] sm:$0xf0] }
  0x4f   :  { %1774 = vmatmul.bf16.vlgmr.msra.gmra.mxu2 %v4364_v8  ;;  %1748 = vmatmul.bf16.vlgmr.msra.gmra.mxu0 %v4366_v9  ;;  %v2992_v39 = vld [vmem:[#allocation2 + $0x2a0] sm:$0xf0]  ;;  %v2739_v44 = vor.u32 %v3964_v35, %v2736_v36  ;;  %v4001_v23 = vld [vmem:[#allocation2 + $0x1a4] sm:$0xf0] }
  0x50   :  { %1818 = vmatpush.bf16.msrb.mxu2 %v3411_v42  ;;  %1793 = vmatpush.bf16.msrb.mxu0 %v2867_v52  ;;  %v4092_v40 = vld [vmem:[#allocation2 + $0x484] sm:$0xf]  ;;  %v2995_v45 = vor.u32 %v4028_v37, %v2992_v39  ;;  %v3126_v24 = vld [vmem:[#allocation2 + $0x388] sm:$0xf] }
  0x51   :  { %1787 = vmatmul.bf16.vlgmr.msra.gmra.mxu3 %v4371_v15  ;;  %v3248_v41 = vld [vmem:[#allocation2 + $0x4a0] sm:$0xf0]  ;;  %v4065_v27 = vld [vmem:[#allocation2 + $0x3a4] sm:$0xf0] }
  0x52   :  { %1831 = vmatpush.bf16.msrb.mxu3 %v3667_v46  ;;  %1806 = vmatpush.bf16.msrb.mxu1 %v3123_v54  ;;  %v4156_v42 = vld [vmem:[#allocation2 + $0x684] sm:$0xf]  ;;  %v3251_v46 = vor.u32 %v4092_v40, %v3248_v41  ;;  %v4193_v31 = vld [vmem:[#allocation2 + $0x7a4] sm:$0xf0] }
  0x53   :  { %v2704_v48 = vld [vmem:[#allocation2 + $0x60] sm:$0xf0]  ;;  %v3507_v50 = vor.u32 %v4156_v42, %v3504_v43  ;;  %v2838_v35 = vld [vmem:[#allocation2 + $0x148] sm:$0xf] }
  0x54   :  { %1819 = vmatpush.bf16.msrb.mxu2 %v3379_v55  ;;  %1794 = vmatpush.bf16.msrb.mxu0 %v2835_v0  ;;  %v4020_v49 = vld [vmem:[#allocation2 + $0x244] sm:$0xf]  ;;  %v2707_v56 = vor.u32 %v3956_v47, %v2704_v48  ;;  %v3993_v36 = vld [vmem:[#allocation2 + $0x164] sm:$0xf0] }
  0x55   :  { %v2960_v51 = vld [vmem:[#allocation2 + $0x260] sm:$0xf0]  ;;  %v3094_v37 = vld [vmem:[#allocation2 + $0x348] sm:$0xf] }
  0x56   :  { %1832 = vmatpush.bf16.msrb.mxu3 %v3635_v59  ;;  %1807 = vmatpush.bf16.msrb.mxu1 %v3091_v1  ;;  %v4084_v52 = vld [vmem:[#allocation2 + $0x444] sm:$0xf]  ;;  %v2963_v59 = vor.u32 %v4020_v49, %v2960_v51  ;;  %v4057_v39 = vld [vmem:[#allocation2 + $0x364] sm:$0xf0] }
  0x57   :  { %v3216_v53 = vld [vmem:[#allocation2 + $0x460] sm:$0xf0]  ;;  %v3350_v40 = vld [vmem:[#allocation2 + $0x548] sm:$0xf] }
  0x58   :  { %1820 = vmatpush.bf16.msrb.mxu2 %v3347_v5  ;;  %1795 = vmatpush.bf16.msrb.mxu0 %v2803_v18  ;;  %v4148_v54 = vld [vmem:[#allocation2 + $0x644] sm:$0xf]  ;;  %v3219_v60 = vor.u32 %v4084_v52, %v3216_v53  ;;  %v4009_v5 = vld [vmem:[#allocation2 + $0x1e4] sm:$0xf0] }
  0x59   :  { %v3472_v55 = vld [vmem:[#allocation2 + $0x660] sm:$0xf0]  ;;  %v2903_v19 = vor.u32 %v4009_v5, %v2902_v4  ;;  %v4121_v41 = vld [vmem:[#allocation2 + $0x564] sm:$0xf0] }
  0x5a   :  { %1833 = vmatpush.bf16.msrb.mxu3 %v3603_v11  ;;  %1808 = vmatpush.bf16.msrb.mxu1 %v3059_v20  ;;  %v3948_v57 = vld [vmem:[#allocation2 + $0x4] sm:$0xf]  ;;  %v3475_v0 = vor.u32 %v4148_v54, %v3472_v55  ;;  %v3414_v11 = vld [vmem:[#allocation2 + $0x5c8] sm:$0xf]  ;;  %v3159_v20 = vor.u32 %v4073_v10, %v3158_v6 }
  0x5b   :  { %v2672_v58 = vld [vmem:[#allocation2 + $0x20] sm:$0xf0]  ;;  %v3606_v42 = vld [vmem:[#allocation2 + $0x748] sm:$0xf] }
  0x5c   :  { %1821 = vmatpush.bf16.msrb.mxu2 %v3315_v21  ;;  %1796 = vmatpush.bf16.msrb.mxu0 %v2771_v32  ;;  %v4012_v61 = vld [vmem:[#allocation2 + $0x204] sm:$0xf]  ;;  %v2675_v7 = vor.u32 %v3948_v57, %v2672_v58  ;;  %v3415_v21 = vor.u32 %v4137_v12, %v3414_v11  ;;  %v2871_v32 = vor.u32 %v4001_v23, %v2870_v22  ;;  %v4185_v43 = vld [vmem:[#allocation2 + $0x764] sm:$0xf0] }
  0x5d   :  { %v2928_v62 = vld [vmem:[#allocation2 + $0x220] sm:$0xf0]  ;;  %v2806_v47 = vld [vmem:[#allocation2 + $0x108] sm:$0xf] }
  0x5e   :  { %1834 = vmatpush.bf16.msrb.mxu3 %v3571_v26  ;;  %1809 = vmatpush.bf16.msrb.mxu1 %v3027_v33  ;;  %v4076_v63 = vld [vmem:[#allocation2 + $0x404] sm:$0xf]  ;;  %v2931_v13 = vor.u32 %v4012_v61, %v2928_v62  ;;  %v3671_v26 = vor.u32 %v4201_v17, %v3670_v16  ;;  %v3127_v33 = vor.u32 %v4065_v27, %v3126_v24  ;;  %v3985_v48 = vld [vmem:[#allocation2 + $0x124] sm:$0xf0] }
  0x5f   :  { %v3184_v1 = vld [vmem:[#allocation2 + $0x420] sm:$0xf0]  ;;  %v3062_v49 = vld [vmem:[#allocation2 + $0x308] sm:$0xf] }
  0x60   :  { %1822 = vmatpush.bf16.msrb.mxu2 %v3283_v34  ;;  %1797 = vmatpush.bf16.msrb.mxu0 %v2739_v44  ;;  %v4140_v2 = vld [vmem:[#allocation2 + $0x604] sm:$0xf]  ;;  %v3187_v14 = vor.u32 %v4076_v63, %v3184_v1  ;;  %v3383_v34 = vor.u32 %v4129_v29, %v3382_v28  ;;  %v2839_v44 = vor.u32 %v3993_v36, %v2838_v35  ;;  %v4049_v51 = vld [vmem:[#allocation2 + $0x324] sm:$0xf0] }
  0x61   :  { %v3440_v3 = vld [vmem:[#allocation2 + $0x620] sm:$0xf0]  ;;  %v3318_v52 = vld [vmem:[#allocation2 + $0x508] sm:$0xf]  ;;  %v3063_v57 = vor.u32 %v4049_v51, %v3062_v49  ;;  %v4133_v49 = vld [vmem:[#allocation2 + $0x5cc] sm:$0xf] }
  0x62   :  { %1835 = vmatpush.bf16.msrb.mxu3 %v3539_v38  ;;  %1810 = vmatpush.bf16.msrb.mxu1 %v2995_v45  ;;  %v3443_v18 = vor.u32 %v4140_v2, %v3440_v3  ;;  %v3639_v38 = vor.u32 %v4193_v31, %v3638_v30  ;;  %v3095_v45 = vor.u32 %v4057_v39, %v3094_v37  ;;  %v4113_v53 = vld [vmem:[#allocation2 + $0x524] sm:$0xf0] }
  0x63   :  { %v3574_v54 = vld [vmem:[#allocation2 + $0x708] sm:$0xf]  ;;  %v3319_v58 = vor.u32 %v4113_v53, %v3318_v52  ;;  %v4197_v53 = vld [vmem:[#allocation2 + $0x7cc] sm:$0xf] }
  0x64   :  { %1823 = vmatpush.bf16.msrb.mxu2 %v3251_v46  ;;  %1798 = vmatpush.bf16.msrb.mxu0 %v2707_v56  ;;  %v3351_v46 = vor.u32 %v4121_v41, %v3350_v40  ;;  %v4177_v55 = vld [vmem:[#allocation2 + $0x724] sm:$0xf0]  ;;  %v2807_v56 = vor.u32 %v3985_v48, %v2806_v47  ;;  %v3160_v48 = vld [vmem:[#allocation2 + $0x3e8] sm:$0xf0] }
  0x65   :  { %v3030_v61 = vld [vmem:[#allocation2 + $0x2c8] sm:$0xf]  ;;  %v3575_v62 = vor.u32 %v4177_v55, %v3574_v54  ;;  %v3672_v54 = vld [vmem:[#allocation2 + $0x7e8] sm:$0xf0] }
  0x66   :  { %1836 = vmatpush.bf16.msrb.mxu3 %v3507_v50  ;;  %1811 = vmatpush.bf16.msrb.mxu1 %v2963_v59  ;;  %v3607_v50 = vor.u32 %v4185_v43, %v3606_v42  ;;  %v2774_v59 = vld [vmem:[#allocation2 + $0xc8] sm:$0xf] }
  0x67   :  { %v4041_v63 = vld [vmem:[#allocation2 + $0x2e4] sm:$0xf0] }
  0x68   :  { %1824 = vmatpush.bf16.msrb.mxu2 %v3219_v60  ;;  %1799 = vmatpush.bf16.msrb.mxu0 %v2675_v7  ;;  %v3977_v60 = vld [vmem:[#allocation2 + $0xe4] sm:$0xf0]  ;;  %v3031_v5 = vor.u32 %v4041_v63, %v3030_v61  ;;  %v4061_v61 = vld [vmem:[#allocation2 + $0x38c] sm:$0xf] }
  0x69   :  { %v4105_v1 = vld [vmem:[#allocation2 + $0x4e4] sm:$0xf0]  ;;  %v2775_v4 = vor.u32 %v3977_v60, %v2774_v59  ;;  %v3997_v59 = vld [vmem:[#allocation2 + $0x18c] sm:$0xf] }
  0x6a   :  { %1837 = vmatpush.bf16.msrb.mxu3 %v3475_v0  ;;  %1812 = vmatpush.bf16.msrb.mxu1 %v2931_v13  ;;  %v3286_v0 = vld [vmem:[#allocation2 + $0x4c8] sm:$0xf]  ;;  %v2872_v60 = vld [vmem:[#allocation2 + $0x1a8] sm:$0xf0] }
  0x6b   :  { %1800 = vmatmul.bf16.vlgmr.msrb.gmra.mxu0 %v4366_v9  ;;  %v3542_v2 = vld [vmem:[#allocation2 + $0x6c8] sm:$0xf]  ;;  %v3287_v6 = vor.u32 %v4105_v1, %v3286_v0  ;;  %v3128_v63 = vld [vmem:[#allocation2 + $0x3a8] sm:$0xf0] }
  0x6c   :  { %1825 = vmatpush.bf16.msrb.mxu2 %v3187_v14  ;;  %1844 = vmatpush.bf16.msra.mxu0 %v2903_v19  ;;  %v4169_v3 = vld [vmem:[#allocation2 + $0x6e4] sm:$0xf0]  ;;  %v4125_v0 = vld [vmem:[#allocation2 + $0x58c] sm:$0xf] }
  0x6d   :  { %1813 = vmatmul.bf16.vlgmr.msrb.gmra.mxu1 %v4379_v25  ;;  %v2742_v7 = vld [vmem:[#allocation2 + $0x88] sm:$0xf]  ;;  %v3543_v12 = vor.u32 %v4169_v3, %v3542_v2  ;;  %v3384_v1 = vld [vmem:[#allocation2 + $0x5a8] sm:$0xf0] }
  0x6e   :  { %1838 = vmatpush.bf16.msrb.mxu3 %v3443_v18  ;;  %1857 = vmatpush.bf16.msra.mxu1 %v3159_v20  ;;  %v3969_v10 = vld [vmem:[#allocation2 + $0xa4] sm:$0xf0]  ;;  %v4189_v2 = vld [vmem:[#allocation2 + $0x78c] sm:$0xf] }
  0x6f   :  { %1826 = vmatmul.bf16.vlgmr.msrb.gmra.mxu2 %v4364_v8  ;;  %v2998_v11 = vld [vmem:[#allocation2 + $0x288] sm:$0xf]  ;;  %v2743_v19 = vor.u32 %v3969_v10, %v2742_v7  ;;  %v3640_v3 = vld [vmem:[#allocation2 + $0x7a8] sm:$0xf0] }
  0x70   :  { %1870 = vmatpush.bf16.msra.mxu2 %v3415_v21  ;;  %1845 = vmatpush.bf16.msra.mxu0 %v2871_v32  ;;  %v4033_v13 = vld [vmem:[#allocation2 + $0x2a4] sm:$0xf0]  ;;  %v3989_v7 = vld [vmem:[#allocation2 + $0x14c] sm:$0xf] }
  0x71   :  { %1839 = vmatmul.bf16.vlgmr.msrb.gmra.mxu3 %v4371_v15  ;;  %v3254_v14 = vld [vmem:[#allocation2 + $0x488] sm:$0xf]  ;;  %v2999_v20 = vor.u32 %v4033_v13, %v2998_v11  ;;  %v2840_v10 = vld [vmem:[#allocation2 + $0x168] sm:$0xf0] }
  0x72   :  { %1883 = vmatpush.bf16.msra.mxu3 %v3671_v26  ;;  %1858 = vmatpush.bf16.msra.mxu1 %v3127_v33  ;;  %v4097_v16 = vld [vmem:[#allocation2 + $0x4a4] sm:$0xf0]  ;;  %v4053_v11 = vld [vmem:[#allocation2 + $0x34c] sm:$0xf] }
  0x73   :  { %v3510_v17 = vld [vmem:[#allocation2 + $0x688] sm:$0xf]  ;;  %v3255_v21 = vor.u32 %v4097_v16, %v3254_v14  ;;  %v3096_v13 = vld [vmem:[#allocation2 + $0x368] sm:$0xf0] }
  0x74   :  { %1871 = vmatpush.bf16.msra.mxu2 %v3383_v34  ;;  %1846 = vmatpush.bf16.msra.mxu0 %v2839_v44  ;;  %v4161_v18 = vld [vmem:[#allocation2 + $0x6a4] sm:$0xf0]  ;;  %v4005_v44 = vld [vmem:[#allocation2 + $0x1cc] sm:$0xf] }
  0x75   :  { %v2710_v22 = vld [vmem:[#allocation2 + $0x48] sm:$0xf]  ;;  %v3511_v26 = vor.u32 %v4161_v18, %v3510_v17  ;;  %v4117_v14 = vld [vmem:[#allocation2 + $0x54c] sm:$0xf] }
  0x76   :  { %1884 = vmatpush.bf16.msra.mxu3 %v3639_v38  ;;  %1859 = vmatpush.bf16.msra.mxu1 %v3095_v45  ;;  %v3961_v23 = vld [vmem:[#allocation2 + $0x64] sm:$0xf0]  ;;  %v2904_v45 = vld [vmem:[#allocation2 + $0x1e8] sm:$0xf0] }
  0x77   :  { %v2966_v24 = vld [vmem:[#allocation2 + $0x248] sm:$0xf]  ;;  %v2711_v32 = vor.u32 %v3961_v23, %v2710_v22  ;;  %v3352_v16 = vld [vmem:[#allocation2 + $0x568] sm:$0xf0] }
  0x78   :  { %1872 = vmatpush.bf16.msra.mxu2 %v3351_v46  ;;  %1847 = vmatpush.bf16.msra.mxu0 %v2807_v56  ;;  %v4025_v27 = vld [vmem:[#allocation2 + $0x264] sm:$0xf0]  ;;  %v4069_v46 = vld [vmem:[#allocation2 + $0x3cc] sm:$0xf]  ;;  %v2907_v56 = vor.u32 %v4005_v44, %v2904_v45 }
  0x79   :  { %v3222_v28 = vld [vmem:[#allocation2 + $0x448] sm:$0xf]  ;;  %v2967_v35 = vor.u32 %v4025_v27, %v2966_v24  ;;  %v4181_v17 = vld [vmem:[#allocation2 + $0x74c] sm:$0xf] }
  0x7a   :  { %1885 = vmatpush.bf16.msra.mxu3 %v3607_v50  ;;  %1860 = vmatpush.bf16.msra.mxu1 %v3063_v57  ;;  %v4089_v29 = vld [vmem:[#allocation2 + $0x464] sm:$0xf0]  ;;  %v3416_v50 = vld [vmem:[#allocation2 + $0x5e8] sm:$0xf0]  ;;  %v3163_v57 = vor.u32 %v4069_v46, %v3160_v48 }
  0x7b   :  { %v3478_v30 = vld [vmem:[#allocation2 + $0x648] sm:$0xf]  ;;  %v3223_v36 = vor.u32 %v4089_v29, %v3222_v28  ;;  %v3608_v18 = vld [vmem:[#allocation2 + $0x768] sm:$0xf0] }
  0x7c   :  { %1873 = vmatpush.bf16.msra.mxu2 %v3319_v58  ;;  %1848 = vmatpush.bf16.msra.mxu0 %v2775_v4  ;;  %v4153_v31 = vld [vmem:[#allocation2 + $0x664] sm:$0xf0]  ;;  %v3419_v58 = vor.u32 %v4133_v49, %v3416_v50  ;;  %v2875_v4 = vor.u32 %v3997_v59, %v2872_v60  ;;  %v3981_v22 = vld [vmem:[#allocation2 + $0x10c] sm:$0xf] }
  0x7d   :  { %v2678_v33 = vld [vmem:[#allocation2 + $0x8] sm:$0xf]  ;;  %v3479_v40 = vor.u32 %v4153_v31, %v3478_v30  ;;  %v2808_v23 = vld [vmem:[#allocation2 + $0x128] sm:$0xf0] }
  0x7e   :  { %1886 = vmatpush.bf16.msra.mxu3 %v3575_v62  ;;  %1861 = vmatpush.bf16.msra.mxu1 %v3031_v5  ;;  %v3953_v34 = vld [vmem:[#allocation2 + $0x24] sm:$0xf0]  ;;  %v3675_v62 = vor.u32 %v4197_v53, %v3672_v54  ;;  %v3131_v5 = vor.u32 %v4061_v61, %v3128_v63  ;;  %v4045_v24 = vld [vmem:[#allocation2 + $0x30c] sm:$0xf] }
  0x7f   :  { %v2934_v37 = vld [vmem:[#allocation2 + $0x208] sm:$0xf]  ;;  %v2679_v47 = vor.u32 %v3953_v34, %v2678_v33  ;;  %v3064_v27 = vld [vmem:[#allocation2 + $0x328] sm:$0xf0] }
  0x80   :  { %1874 = vmatpush.bf16.msra.mxu2 %v3287_v6  ;;  %1849 = vmatpush.bf16.msra.mxu0 %v2743_v19  ;;  %v4017_v38 = vld [vmem:[#allocation2 + $0x224] sm:$0xf0]  ;;  %v3387_v6 = vor.u32 %v4125_v0, %v3384_v1  ;;  %v2843_v19 = vor.u32 %v3989_v7, %v2840_v10  ;;  %v4109_v28 = vld [vmem:[#allocation2 + $0x50c] sm:$0xf]  ;;  %v3067_v33 = vor.u32 %v4045_v24, %v3064_v27  ;;  %v3422_v24 = vld [vmem:[#allocation2 + $0x5d0] sm:$0xf] }
  0x81   :  { %v3190_v39 = vld [vmem:[#allocation2 + $0x408] sm:$0xf]  ;;  %v2935_v51 = vor.u32 %v4017_v38, %v2934_v37  ;;  %v3320_v29 = vld [vmem:[#allocation2 + $0x528] sm:$0xf0] }
  0x82   :  { %1887 = vmatpush.bf16.msra.mxu3 %v3543_v12  ;;  %1862 = vmatpush.bf16.msra.mxu1 %v2999_v20  ;;  %v4081_v41 = vld [vmem:[#allocation2 + $0x424] sm:$0xf0]  ;;  %v3643_v12 = vor.u32 %v4189_v2, %v3640_v3  ;;  %v3099_v20 = vor.u32 %v4053_v11, %v3096_v13  ;;  %v4173_v30 = vld [vmem:[#allocation2 + $0x70c] sm:$0xf]  ;;  %v3323_v34 = vor.u32 %v4109_v28, %v3320_v29  ;;  %v3678_v29 = vld [vmem:[#allocation2 + $0x7d0] sm:$0xf] }
  0x83   :  { %v3446_v42 = vld [vmem:[#allocation2 + $0x608] sm:$0xf]  ;;  %v3191_v52 = vor.u32 %v4081_v41, %v3190_v39  ;;  %v3576_v31 = vld [vmem:[#allocation2 + $0x728] sm:$0xf0] }
  0x84   :  { %1875 = vmatpush.bf16.msra.mxu2 %v3255_v21  ;;  %v4145_v43 = vld [vmem:[#allocation2 + $0x624] sm:$0xf0]  ;;  %1850 = vmatpush.bf16.msra.mxu0 %v2711_v32  ;;  %v3355_v21 = vor.u32 %v4117_v14, %v3352_v16  ;;  %v2811_v32 = vor.u32 %v3981_v22, %v2808_v23  ;;  %v4037_v37 = vld [vmem:[#allocation2 + $0x2cc] sm:$0xf]  ;;  %v3579_v38 = vor.u32 %v4173_v30, %v3576_v31  ;;  %v4074_v23 = vld [vmem:[#allocation2 + $0x3ec] sm:$0xf0] }
  0x85   :  { %v3447_v55 = vor.u32 %v4145_v43, %v3446_v42  ;;  %v3032_v39 = vld [vmem:[#allocation2 + $0x2e8] sm:$0xf0]  ;;  %v4202_v30 = vld [vmem:[#allocation2 + $0x7ec] sm:$0xf0] }
  0x86   :  { %1888 = vmatpush.bf16.msra.mxu3 %v3511_v26  ;;  %1863 = vmatpush.bf16.msra.mxu1 %v2967_v35  ;;  %v3611_v26 = vor.u32 %v4181_v17, %v3608_v18  ;;  %v3973_v35 = vld [vmem:[#allocation2 + $0xcc] sm:$0xf]  ;;  %v3035_v45 = vor.u32 %v4037_v37, %v3032_v39  ;;  %v3134_v37 = vld [vmem:[#allocation2 + $0x390] sm:$0xf] }
  0x87   :  { %v3288_v41 = vld [vmem:[#allocation2 + $0x4e8] sm:$0xf0]  ;;  %v4066_v39 = vld [vmem:[#allocation2 + $0x3ac] sm:$0xf0] }
  0x88   :  { %1876 = vmatpush.bf16.msra.mxu2 %v3223_v36  ;;  %1851 = vmatpush.bf16.msra.mxu0 %v2679_v47  ;;  %v2776_v36 = vld [vmem:[#allocation2 + $0xe8] sm:$0xf0] }
  0x89   :  { %v4165_v42 = vld [vmem:[#allocation2 + $0x6cc] sm:$0xf]  ;;  %v2779_v44 = vor.u32 %v3973_v35, %v2776_v36  ;;  %v2878_v35 = vld [vmem:[#allocation2 + $0x190] sm:$0xf] }
  0x8a   :  { %1889 = vmatpush.bf16.msra.mxu3 %v3479_v40  ;;  %1864 = vmatpush.bf16.msra.mxu1 %v2935_v51  ;;  %v4101_v40 = vld [vmem:[#allocation2 + $0x4cc] sm:$0xf]  ;;  %v4002_v36 = vld [vmem:[#allocation2 + $0x1ac] sm:$0xf0] }
  0x8b   :  { %1852 = vmatmul.bf16.vlgmr.msra.gmra.mxu0 %v4366_v9  ;;  %v3544_v43 = vld [vmem:[#allocation2 + $0x6e8] sm:$0xf0]  ;;  %v3291_v46 = vor.u32 %v4101_v40, %v3288_v41  ;;  %v3390_v40 = vld [vmem:[#allocation2 + $0x590] sm:$0xf] }
  0x8c   :  { %1877 = vmatpush.bf16.msra.mxu2 %v3191_v52  ;;  %1896 = vmatpush.bf16.msrb.mxu0 %v2907_v56  ;;  %v3965_v47 = vld [vmem:[#allocation2 + $0x8c] sm:$0xf]  ;;  %v3547_v50 = vor.u32 %v4165_v42, %v3544_v43  ;;  %v4130_v41 = vld [vmem:[#allocation2 + $0x5ac] sm:$0xf0] }
  0x8d   :  { %1865 = vmatmul.bf16.vlgmr.msra.gmra.mxu1 %v4379_v25  ;;  %v2744_v48 = vld [vmem:[#allocation2 + $0xa8] sm:$0xf0]  ;;  %v3646_v42 = vld [vmem:[#allocation2 + $0x790] sm:$0xf] }
  0x8e   :  { %1890 = vmatpush.bf16.msra.mxu3 %v3447_v55  ;;  %1909 = vmatpush.bf16.msrb.mxu1 %v3163_v57  ;;  %v4029_v49 = vld [vmem:[#allocation2 + $0x28c] sm:$0xf]  ;;  %v2747_v56 = vor.u32 %v3965_v47, %v2744_v48  ;;  %v4194_v43 = vld [vmem:[#allocation2 + $0x7ac] sm:$0xf0] }
  0x8f   :  { %1878 = vmatmul.bf16.vlgmr.msra.gmra.mxu2 %v4364_v8  ;;  %v3000_v51 = vld [vmem:[#allocation2 + $0x2a8] sm:$0xf0]  ;;  %v2846_v47 = vld [vmem:[#allocation2 + $0x150] sm:$0xf] }
  0x90   :  { %1922 = vmatpush.bf16.msrb.mxu2 %v3419_v58  ;;  %1897 = vmatpush.bf16.msrb.mxu0 %v2875_v4  ;;  %v4093_v52 = vld [vmem:[#allocation2 + $0x48c] sm:$0xf]  ;;  %v3003_v57 = vor.u32 %v4029_v49, %v3000_v51  ;;  %v3994_v48 = vld [vmem:[#allocation2 + $0x16c] sm:$0xf0] }
  0x91   :  { %1891 = vmatmul.bf16.vlgmr.msra.gmra.mxu3 %v4371_v15  ;;  %v3256_v53 = vld [vmem:[#allocation2 + $0x4a8] sm:$0xf0]  ;;  %v3102_v49 = vld [vmem:[#allocation2 + $0x350] sm:$0xf] }
  0x92   :  { %1935 = vmatpush.bf16.msrb.mxu3 %v3675_v62  ;;  %1910 = vmatpush.bf16.msrb.mxu1 %v3131_v5  ;;  %v4157_v54 = vld [vmem:[#allocation2 + $0x68c] sm:$0xf]  ;;  %v3259_v58 = vor.u32 %v4093_v52, %v3256_v53  ;;  %v4058_v51 = vld [vmem:[#allocation2 + $0x36c] sm:$0xf0] }
  0x93   :  { %v3512_v55 = vld [vmem:[#allocation2 + $0x6a8] sm:$0xf0]  ;;  %v3358_v52 = vld [vmem:[#allocation2 + $0x550] sm:$0xf] }
  0x94   :  { %1923 = vmatpush.bf16.msrb.mxu2 %v3387_v6  ;;  %1898 = vmatpush.bf16.msrb.mxu0 %v2843_v19  ;;  %v3957_v59 = vld [vmem:[#allocation2 + $0x4c] sm:$0xf]  ;;  %v3515_v62 = vor.u32 %v4157_v54, %v3512_v55  ;;  %v2910_v19 = vld [vmem:[#allocation2 + $0x1d0] sm:$0xf] }
  0x95   :  { %v2712_v60 = vld [vmem:[#allocation2 + $0x68] sm:$0xf0]  ;;  %v4122_v53 = vld [vmem:[#allocation2 + $0x56c] sm:$0xf0] }
  0x96   :  { %1936 = vmatpush.bf16.msrb.mxu3 %v3643_v12  ;;  %1911 = vmatpush.bf16.msrb.mxu1 %v3099_v20  ;;  %v4021_v61 = vld [vmem:[#allocation2 + $0x24c] sm:$0xf]  ;;  %v2715_v4 = vor.u32 %v3957_v59, %v2712_v60  ;;  %v4010_v20 = vld [vmem:[#allocation2 + $0x1ec] sm:$0xf0] }
  0x97   :  { %v2968_v63 = vld [vmem:[#allocation2 + $0x268] sm:$0xf0]  ;;  %v3614_v54 = vld [vmem:[#allocation2 + $0x750] sm:$0xf] }
  0x98   :  { %1924 = vmatpush.bf16.msrb.mxu2 %v3355_v21  ;;  %1899 = vmatpush.bf16.msrb.mxu0 %v2811_v32  ;;  %v4085_v0 = vld [vmem:[#allocation2 + $0x44c] sm:$0xf]  ;;  %v2971_v7 = vor.u32 %v4021_v61, %v2968_v63  ;;  %v3166_v21 = vld [vmem:[#allocation2 + $0x3d0] sm:$0xf]  ;;  %v2911_v32 = vor.u32 %v4010_v20, %v2910_v19 }
  0x99   :  { %v3224_v1 = vld [vmem:[#allocation2 + $0x468] sm:$0xf0]  ;;  %v4186_v55 = vld [vmem:[#allocation2 + $0x76c] sm:$0xf0] }
  0x9a   :  { %1937 = vmatpush.bf16.msrb.mxu3 %v3611_v26  ;;  %1912 = vmatpush.bf16.msrb.mxu1 %v3067_v33  ;;  %v4149_v2 = vld [vmem:[#allocation2 + $0x64c] sm:$0xf]  ;;  %v3227_v10 = vor.u32 %v4085_v0, %v3224_v1  ;;  %v4138_v26 = vld [vmem:[#allocation2 + $0x5ec] sm:$0xf0]  ;;  %v3167_v33 = vor.u32 %v4074_v23, %v3166_v21 }
  0x9b   :  { %v3480_v3 = vld [vmem:[#allocation2 + $0x668] sm:$0xf0]  ;;  %v2814_v59 = vld [vmem:[#allocation2 + $0x110] sm:$0xf] }
  0x9c   :  { %1925 = vmatpush.bf16.msrb.mxu2 %v3323_v34  ;;  %1900 = vmatpush.bf16.msrb.mxu0 %v2779_v44  ;;  %v3949_v5 = vld [vmem:[#allocation2 + $0xc] sm:$0xf]  ;;  %v3483_v14 = vor.u32 %v4149_v2, %v3480_v3  ;;  %v3423_v34 = vor.u32 %v4138_v26, %v3422_v24  ;;  %v2879_v44 = vor.u32 %v4002_v36, %v2878_v35  ;;  %v3986_v60 = vld [vmem:[#allocation2 + $0x12c] sm:$0xf0] }
  0x9d   :  { %v2680_v6 = vld [vmem:[#allocation2 + $0x28] sm:$0xf0]  ;;  %v3070_v61 = vld [vmem:[#allocation2 + $0x310] sm:$0xf] }
  0x9e   :  { %1938 = vmatpush.bf16.msrb.mxu3 %v3579_v38  ;;  %1913 = vmatpush.bf16.msrb.mxu1 %v3035_v45  ;;  %v4013_v11 = vld [vmem:[#allocation2 + $0x20c] sm:$0xf]  ;;  %v2683_v22 = vor.u32 %v3949_v5, %v2680_v6  ;;  %v3679_v38 = vor.u32 %v4202_v30, %v3678_v29  ;;  %v3135_v45 = vor.u32 %v4066_v39, %v3134_v37  ;;  %v4050_v63 = vld [vmem:[#allocation2 + $0x32c] sm:$0xf0] }
  0x9f   :  { %v2936_v12 = vld [vmem:[#allocation2 + $0x228] sm:$0xf0]  ;;  %v3326_v0 = vld [vmem:[#allocation2 + $0x510] sm:$0xf]  ;;  %v3071_v5 = vor.u32 %v4050_v63, %v3070_v61  ;;  %v4134_v61 = vld [vmem:[#allocation2 + $0x5d4] sm:$0xf] }
  0xa0   :  { %1926 = vmatpush.bf16.msrb.mxu2 %v3291_v46  ;;  %1901 = vmatpush.bf16.msrb.mxu0 %v2747_v56  ;;  %v4077_v13 = vld [vmem:[#allocation2 + $0x40c] sm:$0xf]  ;;  %v2939_v27 = vor.u32 %v4013_v11, %v2936_v12  ;;  %v3391_v46 = vor.u32 %v4130_v41, %v3390_v40  ;;  %v2847_v56 = vor.u32 %v3994_v48, %v2846_v47  ;;  %v4114_v1 = vld [vmem:[#allocation2 + $0x52c] sm:$0xf0] }
  0xa1   :  { %v3192_v16 = vld [vmem:[#allocation2 + $0x428] sm:$0xf0]  ;;  %v3582_v2 = vld [vmem:[#allocation2 + $0x710] sm:$0xf]  ;;  %v3327_v6 = vor.u32 %v4114_v1, %v3326_v0  ;;  %v4198_v1 = vld [vmem:[#allocation2 + $0x7d4] sm:$0xf] }
  0xa2   :  { %1939 = vmatpush.bf16.msrb.mxu3 %v3547_v50  ;;  %1914 = vmatpush.bf16.msrb.mxu1 %v3003_v57  ;;  %v4141_v17 = vld [vmem:[#allocation2 + $0x60c] sm:$0xf]  ;;  %v3195_v28 = vor.u32 %v4077_v13, %v3192_v16  ;;  %v3647_v50 = vor.u32 %v4194_v43, %v3646_v42  ;;  %v3103_v57 = vor.u32 %v4058_v51, %v3102_v49  ;;  %v4178_v3 = vld [vmem:[#allocation2 + $0x72c] sm:$0xf0] }
  0xa3   :  { %v3448_v18 = vld [vmem:[#allocation2 + $0x628] sm:$0xf0]  ;;  %v3038_v11 = vld [vmem:[#allocation2 + $0x2d0] sm:$0xf]  ;;  %v3583_v12 = vor.u32 %v4178_v3, %v3582_v2  ;;  %v3680_v2 = vld [vmem:[#allocation2 + $0x7f0] sm:$0xf0] }
  0xa4   :  { %1927 = vmatpush.bf16.msrb.mxu2 %v3259_v58  ;;  %1902 = vmatpush.bf16.msrb.mxu0 %v2715_v4  ;;  %v3451_v31 = vor.u32 %v4141_v17, %v3448_v18  ;;  %v3359_v58 = vor.u32 %v4122_v53, %v3358_v52  ;;  %v2815_v4 = vor.u32 %v3986_v60, %v2814_v59  ;;  %v4042_v13 = vld [vmem:[#allocation2 + $0x2ec] sm:$0xf0]  ;;  %v3168_v60 = vld [vmem:[#allocation2 + $0x3f0] sm:$0xf0] }
  0xa5   :  { %v4106_v16 = vld [vmem:[#allocation2 + $0x4ec] sm:$0xf0]  ;;  %v3039_v20 = vor.u32 %v4042_v13, %v3038_v11  ;;  %v4062_v11 = vld [vmem:[#allocation2 + $0x394] sm:$0xf] }
  0xa6   :  { %1940 = vmatpush.bf16.msrb.mxu3 %v3515_v62  ;;  %1915 = vmatpush.bf16.msrb.mxu1 %v2971_v7  ;;  %v3615_v62 = vor.u32 %v4186_v55, %v3614_v54  ;;  %v2782_v7 = vld [vmem:[#allocation2 + $0xd0] sm:$0xf]  ;;  %v3136_v13 = vld [vmem:[#allocation2 + $0x3b0] sm:$0xf0] }
  0xa7   :  { %v3550_v17 = vld [vmem:[#allocation2 + $0x6d0] sm:$0xf] }
  0xa8   :  { %1928 = vmatpush.bf16.msrb.mxu2 %v3227_v10  ;;  %1903 = vmatpush.bf16.msrb.mxu0 %v2683_v22  ;;  %v3978_v10 = vld [vmem:[#allocation2 + $0xec] sm:$0xf0] }
  0xa9   :  { %v4170_v18 = vld [vmem:[#allocation2 + $0x6ec] sm:$0xf0]  ;;  %v2783_v19 = vor.u32 %v3978_v10, %v2782_v7  ;;  %v3998_v7 = vld [vmem:[#allocation2 + $0x194] sm:$0xf] }
  0xaa   :  { %1941 = vmatpush.bf16.msrb.mxu3 %v3483_v14  ;;  %1916 = vmatpush.bf16.msrb.mxu1 %v2939_v27  ;;  %v3294_v14 = vld [vmem:[#allocation2 + $0x4d0] sm:$0xf]  ;;  %v3551_v26 = vor.u32 %v4170_v18, %v3550_v17  ;;  %v2880_v10 = vld [vmem:[#allocation2 + $0x1b0] sm:$0xf0] }
  0xab   :  { %1904 = vmatmul.bf16.vlgmr.msrb.gmra.mxu0 %v4366_v9  ;;  %v3295_v21 = vor.u32 %v4106_v16, %v3294_v14  ;;  %v2750_v22 = vld [vmem:[#allocation2 + $0x90] sm:$0xf]  ;;  %v4126_v14 = vld [vmem:[#allocation2 + $0x594] sm:$0xf] }
  0xac   :  { %1929 = vmatpush.bf16.msrb.mxu2 %v3195_v28  ;;  %1948 = vmatpush.bf16.msra.mxu0 %v2911_v32  ;;  %v3970_v23 = vld [vmem:[#allocation2 + $0xac] sm:$0xf0]  ;;  %v3392_v16 = vld [vmem:[#allocation2 + $0x5b0] sm:$0xf0] }
  0xad   :  { %1917 = vmatmul.bf16.vlgmr.msrb.gmra.mxu1 %v4379_v25  ;;  %v3006_v24 = vld [vmem:[#allocation2 + $0x290] sm:$0xf]  ;;  %v2751_v32 = vor.u32 %v3970_v23, %v2750_v22  ;;  %v4190_v17 = vld [vmem:[#allocation2 + $0x794] sm:$0xf]  ;;  %v3395_v22 = vor.u32 %v4126_v14, %v3392_v16 }
  0xae   :  { %1942 = vmatpush.bf16.msrb.mxu3 %v3451_v31  ;;  %1961 = vmatpush.bf16.msra.mxu1 %v3167_v33  ;;  %v4034_v27 = vld [vmem:[#allocation2 + $0x2ac] sm:$0xf0]  ;;  %v3648_v18 = vld [vmem:[#allocation2 + $0x7b0] sm:$0xf0] }
  0xaf   :  { %1930 = vmatmul.bf16.vlgmr.msrb.gmra.mxu2 %v4364_v8  ;;  %v3262_v28 = vld [vmem:[#allocation2 + $0x490] sm:$0xf]  ;;  %v3007_v33 = vor.u32 %v4034_v27, %v3006_v24  ;;  %v2848_v23 = vld [vmem:[#allocation2 + $0x170] sm:$0xf0]  ;;  %v3651_v27 = vor.u32 %v4190_v17, %v3648_v18 }
  0xb0   :  { %1974 = vmatpush.bf16.msra.mxu2 %v3423_v34  ;;  %1949 = vmatpush.bf16.msra.mxu0 %v2879_v44  ;;  %v4098_v29 = vld [vmem:[#allocation2 + $0x4ac] sm:$0xf0]  ;;  %v4054_v24 = vld [vmem:[#allocation2 + $0x354] sm:$0xf] }
  0xb1   :  { %1943 = vmatmul.bf16.vlgmr.msrb.gmra.mxu3 %v4371_v15  ;;  %v3518_v30 = vld [vmem:[#allocation2 + $0x690] sm:$0xf]  ;;  %v3263_v34 = vor.u32 %v4098_v29, %v3262_v28  ;;  %v4118_v28 = vld [vmem:[#allocation2 + $0x554] sm:$0xf] }
  0xb2   :  { %1987 = vmatpush.bf16.msra.mxu3 %v3679_v38  ;;  %1962 = vmatpush.bf16.msra.mxu1 %v3135_v45  ;;  %v4162_v31 = vld [vmem:[#allocation2 + $0x6ac] sm:$0xf0]  ;;  %v3360_v29 = vld [vmem:[#allocation2 + $0x570] sm:$0xf0] }
  0xb3   :  { %v2718_v35 = vld [vmem:[#allocation2 + $0x50] sm:$0xf]  ;;  %v3519_v38 = vor.u32 %v4162_v31, %v3518_v30  ;;  %v4395_v30 = vld [vmem:[#allocation2 + $0x800] sm:$0x11]  ;;  %v4182_v31 = vld [vmem:[#allocation2 + $0x754] sm:$0xf] }
  0xb4   :  { %1975 = vmatpush.bf16.msra.mxu2 %v3391_v46  ;;  %1950 = vmatpush.bf16.msra.mxu0 %v2847_v56  ;;  %v3962_v36 = vld [vmem:[#allocation2 + $0x6c] sm:$0xf0]  ;;  %v4006_v56 = vld [vmem:[#allocation2 + $0x1d4] sm:$0xf] }
  0xb5   :  { %v2974_v37 = vld [vmem:[#allocation2 + $0x250] sm:$0xf]  ;;  %v2719_v44 = vor.u32 %v3962_v36, %v2718_v35  ;;  %v3363_v35 = vor.u32 %v4118_v28, %v3360_v29  ;;  %v3982_v36 = vld [vmem:[#allocation2 + $0x114] sm:$0xf] }
  0xb6   :  { %1988 = vmatpush.bf16.msra.mxu3 %v3647_v50  ;;  %1963 = vmatpush.bf16.msra.mxu1 %v3103_v57  ;;  %v4026_v39 = vld [vmem:[#allocation2 + $0x26c] sm:$0xf0]  ;;  %v2912_v57 = vld [vmem:[#allocation2 + $0x1f0] sm:$0xf0] }
  0xb7   :  { %v3230_v40 = vld [vmem:[#allocation2 + $0x450] sm:$0xf]  ;;  %v2975_v47 = vor.u32 %v4026_v39, %v2974_v37  ;;  %v2816_v37 = vld [vmem:[#allocation2 + $0x130] sm:$0xf0]  ;;  %v310_v39 = vunpack.c.l.bf16 %v4395_v30 }
  0xb8   :  { %1976 = vmatpush.bf16.msra.mxu2 %v3359_v58  ;;  %1951 = vmatpush.bf16.msra.mxu0 %v2815_v4  ;;  %v4090_v41 = vld [vmem:[#allocation2 + $0x46c] sm:$0xf0]  ;;  %v4070_v58 = vld [vmem:[#allocation2 + $0x3d4] sm:$0xf]  ;;  %v2915_v4 = vor.u32 %v4006_v56, %v2912_v57 }
  0xb9   :  { %v3486_v42 = vld [vmem:[#allocation2 + $0x650] sm:$0xf]  ;;  %v3231_v48 = vor.u32 %v4090_v41, %v3230_v40  ;;  %v3072_v41 = vld [vmem:[#allocation2 + $0x330] sm:$0xf0] }
  0xba   :  { %1989 = vmatpush.bf16.msra.mxu3 %v3615_v62  ;;  %1964 = vmatpush.bf16.msra.mxu1 %v3071_v5  ;;  %v4154_v43 = vld [vmem:[#allocation2 + $0x66c] sm:$0xf0]  ;;  %v3424_v62 = vld [vmem:[#allocation2 + $0x5f0] sm:$0xf0]  ;;  %v3171_v5 = vor.u32 %v4070_v58, %v3168_v60 }
  0xbb   :  { %v2686_v45 = vld [vmem:[#allocation2 + $0x10] sm:$0xf]  ;;  %v3487_v52 = vor.u32 %v4154_v43, %v3486_v42  ;;  %v4110_v42 = vld [vmem:[#allocation2 + $0x514] sm:$0xf] }
  0xbc   :  { %1977 = vmatpush.bf16.msra.mxu2 %v3327_v6  ;;  %1952 = vmatpush.bf16.msra.mxu0 %v2783_v19  ;;  %v3954_v46 = vld [vmem:[#allocation2 + $0x2c] sm:$0xf0]  ;;  %v3427_v6 = vor.u32 %v4134_v61, %v3424_v62  ;;  %v2883_v19 = vor.u32 %v3998_v7, %v2880_v10  ;;  %v3328_v43 = vld [vmem:[#allocation2 + $0x530] sm:$0xf0] }
  0xbd   :  { %v2942_v49 = vld [vmem:[#allocation2 + $0x210] sm:$0xf]  ;;  %v2687_v59 = vor.u32 %v3954_v46, %v2686_v45  ;;  %v3584_v45 = vld [vmem:[#allocation2 + $0x730] sm:$0xf0]  ;;  %v2819_v46 = vor.u32 %v3982_v36, %v2816_v37 }
  0xbe   :  { %1990 = vmatpush.bf16.msra.mxu3 %v3583_v12  ;;  %1965 = vmatpush.bf16.msra.mxu1 %v3039_v20  ;;  %v4018_v50 = vld [vmem:[#allocation2 + $0x22c] sm:$0xf0]  ;;  %v3683_v12 = vor.u32 %v4198_v1, %v3680_v2  ;;  %v3990_v20 = vld [vmem:[#allocation2 + $0x154] sm:$0xf] }
  0xbf   :  { %v3198_v51 = vld [vmem:[#allocation2 + $0x410] sm:$0xf]  ;;  %v2943_v63 = vor.u32 %v4018_v50, %v2942_v49  ;;  %v3331_v49 = vor.u32 %v4110_v42, %v3328_v43  ;;  %v2784_v50 = vld [vmem:[#allocation2 + $0xf0] sm:$0xf0] }
  0xc0   :  { %1978 = vmatpush.bf16.msra.mxu2 %v3295_v21  ;;  %1953 = vmatpush.bf16.msra.mxu0 %v2751_v32  ;;  %v4082_v53 = vld [vmem:[#allocation2 + $0x42c] sm:$0xf0]  ;;  %v3139_v21 = vor.u32 %v4062_v11, %v3136_v13  ;;  %v3616_v32 = vld [vmem:[#allocation2 + $0x770] sm:$0xf0] }
  0xc1   :  { %v3454_v54 = vld [vmem:[#allocation2 + $0x610] sm:$0xf]  ;;  %v3199_v0 = vor.u32 %v4082_v53, %v3198_v51  ;;  %v3619_v40 = vor.u32 %v4182_v31, %v3616_v32  ;;  %v4038_v51 = vld [vmem:[#allocation2 + $0x2d4] sm:$0xf] }
  0xc2   :  { %1991 = vmatpush.bf16.msra.mxu3 %v3551_v26  ;;  %1966 = vmatpush.bf16.msra.mxu1 %v3007_v33  ;;  %v4146_v55 = vld [vmem:[#allocation2 + $0x62c] sm:$0xf0]  ;;  %v3104_v26 = vld [vmem:[#allocation2 + $0x370] sm:$0xf0]  ;;  %v2851_v33 = vor.u32 %v3990_v20, %v2848_v23 }
  0xc3   :  { %v3455_v3 = vor.u32 %v4146_v55, %v3454_v54  ;;  %v3040_v54 = vld [vmem:[#allocation2 + $0x2f0] sm:$0xf0] }
  0xc4   :  { %1979 = vmatpush.bf16.msra.mxu2 %v3263_v34  ;;  %1954 = vmatpush.bf16.msra.mxu0 %v2719_v44  ;;  %v3107_v34 = vor.u32 %v4054_v24, %v3104_v26  ;;  %v4174_v44 = vld [vmem:[#allocation2 + $0x714] sm:$0xf]  ;;  %v3043_v61 = vor.u32 %v4038_v51, %v3040_v54  ;;  %v4139_v51 = vld [vmem:[#allocation2 + $0x5f4] sm:$0xf0] }
  0xc5   :  { %v3587_v53 = vor.u32 %v4174_v44, %v3584_v45  ;;  %v4102_v55 = vld [vmem:[#allocation2 + $0x4d4] sm:$0xf]  ;;  %v2918_v45 = vld [vmem:[#allocation2 + $0x1d8] sm:$0xf] }
  0xc6   :  { %1992 = vmatpush.bf16.msra.mxu3 %v3519_v38  ;;  %1967 = vmatpush.bf16.msra.mxu1 %v2975_v47  ;;  %v4046_v38 = vld [vmem:[#allocation2 + $0x314] sm:$0xf] }
  0xc7   :  { %v3974_v47 = vld [vmem:[#allocation2 + $0xd4] sm:$0xf] }
  0xc8   :  { %1980 = vmatpush.bf16.msra.mxu2 %v3231_v48  ;;  %1955 = vmatpush.bf16.msra.mxu0 %v2687_v59  ;;  %v3075_v48 = vor.u32 %v4046_v38, %v3072_v41  ;;  %v3296_v56 = vld [vmem:[#allocation2 + $0x4f0] sm:$0xf0]  ;;  %v2787_v59 = vor.u32 %v3974_v47, %v2784_v50  ;;  %v3174_v47 = vld [vmem:[#allocation2 + $0x3d8] sm:$0xf] }
  0xc9   :  { %v4166_v57 = vld [vmem:[#allocation2 + $0x6d4] sm:$0xf]  ;;  %v3299_v62 = vor.u32 %v4102_v55, %v3296_v56  ;;  %v3430_v50 = vld [vmem:[#allocation2 + $0x5d8] sm:$0xf] }
  0xca   :  { %1993 = vmatpush.bf16.msra.mxu3 %v3487_v52  ;;  %1968 = vmatpush.bf16.msra.mxu1 %v2943_v63  ;;  %v452_v52 = vperm.slane %v310_v39, 0  ;;  %v3552_v58 = vld [vmem:[#allocation2 + $0x6f0] sm:$0xf0]  ;;  %v3686_v55 = vld [vmem:[#allocation2 + $0x7d8] sm:$0xf] }
  0xcb   :  { %1956 = vmatmul.bf16.vlgmr.msra.gmra.mxu0 %v4366_v9  ;;  %v3966_v63 = vld [vmem:[#allocation2 + $0x94] sm:$0xf]  ;;  %v4203_v56 = vld [vmem:[#allocation2 + $0x7f4] sm:$0xf0] }
  0xcc   :  { %1981 = vmatpush.bf16.msra.mxu2 %v3199_v0  ;;  %2000 = vmatpush.bf16.msrb.mxu0 %v2915_v4  ;;  %v1749_v60 = vpop.f32.mrf.mxu0  ;;  %v2752_v0 = vld [vmem:[#allocation2 + $0xb0] sm:$0xf0] }
  0xcd   :  { %1969 = vmatmul.bf16.vlgmr.msra.gmra.mxu1 %v4379_v25  ;;  %v4030_v1 = vld [vmem:[#allocation2 + $0x294] sm:$0xf]  ;;  %v1750_v2 = vadd.f32 %v1749_v60, %v452_v52  ;;  %v2755_v11 = vor.u32 %v3966_v63, %v2752_v0  ;;  %v4003_v63 = vld [vmem:[#allocation2 + $0x1b4] sm:$0xf0] }
  0xce   :  { %1994 = vmatpush.bf16.msra.mxu3 %v3455_v3  ;;  %2013 = vmatpush.bf16.msrb.mxu1 %v3171_v5  ;;  %v3555_v3 = vor.u32 %v4166_v57, %v3552_v58  ;;  %v3008_v4 = vld [vmem:[#allocation2 + $0x2b0] sm:$0xf0]  ;;  %v3142_v0 = vld [vmem:[#allocation2 + $0x398] sm:$0xf] }
  0xcf   :  { %1982 = vmatmul.bf16.vlgmr.msra.gmra.mxu2 %v4364_v8  ;;  %v4094_v5 = vld [vmem:[#allocation2 + $0x494] sm:$0xf]  ;;  %v3011_v13 = vor.u32 %v4030_v1, %v3008_v4  ;;  %v3398_v4 = vld [vmem:[#allocation2 + $0x598] sm:$0xf] }
  0xd0   :  { %2026 = vmatpush.bf16.msrb.mxu2 %v3427_v6  ;;  %2001 = vmatpush.bf16.msrb.mxu0 %v2883_v19  ;;  %v3264_v6 = vld [vmem:[#allocation2 + $0x4b0] sm:$0xf0] }
  0xd1   :  { %1995 = vmatmul.bf16.vlgmr.msra.gmra.mxu3 %v4371_v15  ;;  %v4158_v7 = vld [vmem:[#allocation2 + $0x694] sm:$0xf]  ;;  %v3267_v14 = vor.u32 %v4094_v5, %v3264_v6  ;;  %v4131_v5 = vld [vmem:[#allocation2 + $0x5b4] sm:$0xf0] }
  0xd2   :  { %2039 = vmatpush.bf16.msrb.mxu3 %v3683_v12  ;;  %2014 = vmatpush.bf16.msrb.mxu1 %v3139_v21  ;;  %v3520_v10 = vld [vmem:[#allocation2 + $0x6b0] sm:$0xf0]  ;;  %v1762_v12 = vpop.f32.mrf.mxu1  ;;  %v1775_v24 = vpop.f32.mrf.mxu2  ;;  %v3654_v6 = vld [vmem:[#allocation2 + $0x798] sm:$0xf] }
  0xd3   :  { %v3958_v16 = vld [vmem:[#allocation2 + $0x54] sm:$0xf]  ;;  %v1763_v19 = vadd.f32 %v1762_v12, %v1750_v2  ;;  %v3523_v20 = vor.u32 %v4158_v7, %v3520_v10  ;;  %v3687_v2 = vor.u32 %v4203_v56, %v3686_v55  ;;  %v4195_v7 = vld [vmem:[#allocation2 + $0x7b4] sm:$0xf0]  ;;  %v3399_v12 = vor.u32 %v4131_v5, %v3398_v4 }
  0xd4   :  { %2027 = vmatpush.bf16.msrb.mxu2 %v3395_v22  ;;  %2002 = vmatpush.bf16.msrb.mxu0 %v2851_v33  ;;  %v2720_v17 = vld [vmem:[#allocation2 + $0x70] sm:$0xf0]  ;;  %v1788_v29 = vpop.f32.mrf.mxu3  ;;  %v3526_v4 = vld [vmem:[#allocation2 + $0x698] sm:$0xf] }
  0xd5   :  { %v4022_v18 = vld [vmem:[#allocation2 + $0x254] sm:$0xf]  ;;  %v1776_v28 = vadd.f32 %v1775_v24, %v1763_v19  ;;  %v2723_v31 = vor.u32 %v3958_v16, %v2720_v17  ;;  %v3110_v16 = vld [vmem:[#allocation2 + $0x358] sm:$0xf]  ;;  %v311_v17 = vunpack.c.h.bf16 %v4395_v30 }
  0xd6   :  { %2040 = vmatpush.bf16.msrb.mxu3 %v3651_v27  ;;  %2015 = vmatpush.bf16.msrb.mxu1 %v3107_v34  ;;  %v2976_v21 = vld [vmem:[#allocation2 + $0x270] sm:$0xf0]  ;;  %v1751_v34 = vpop.f32.mrf.mxu0  ;;  %v4059_v19 = vld [vmem:[#allocation2 + $0x374] sm:$0xf0] }
  0xd7   :  { %v4086_v22 = vld [vmem:[#allocation2 + $0x454] sm:$0xf]  ;;  %v3111_v30 = vor.u32 %v4059_v19, %v3110_v16  ;;  %v3334_v34 = vld [vmem:[#allocation2 + $0x518] sm:$0xf] }
  0xd8   :  { %2028 = vmatpush.bf16.msrb.mxu2 %v3363_v35  ;;  %2003 = vmatpush.bf16.msrb.mxu0 %v2819_v46  ;;  %v3232_v23 = vld [vmem:[#allocation2 + $0x470] sm:$0xf0]  ;;  %v2979_v35 = vor.u32 %v4022_v18, %v2976_v21  ;;  %v4011_v46 = vld [vmem:[#allocation2 + $0x1f4] sm:$0xf0]  ;;  %v3655_v18 = vor.u32 %v4195_v7, %v3654_v6 }
  0xd9   :  { %v4150_v26 = vld [vmem:[#allocation2 + $0x654] sm:$0xf]  ;;  %v3235_v36 = vor.u32 %v4086_v22, %v3232_v23  ;;  %v2919_v58 = vor.u32 %v4011_v46, %v2918_v45  ;;  %v4123_v21 = vld [vmem:[#allocation2 + $0x574] sm:$0xf0] }
  0xda   :  { %2041 = vmatpush.bf16.msrb.mxu3 %v3619_v40  ;;  %2016 = vmatpush.bf16.msrb.mxu1 %v3075_v48  ;;  %v3488_v27 = vld [vmem:[#allocation2 + $0x670] sm:$0xf0]  ;;  %v4401_v40 = vadd.f32 %v1788_v29, %v1776_v28  ;;  %v1764_v52 = vpop.f32.mrf.mxu1  ;;  %v3622_v22 = vld [vmem:[#allocation2 + $0x758] sm:$0xf] }
  0xdb   :  { %v3950_v32 = vld [vmem:[#allocation2 + $0x14] sm:$0xf]  ;;  %v3491_v41 = vor.u32 %v4150_v26, %v3488_v27  ;;  %v4187_v23 = vld [vmem:[#allocation2 + $0x774] sm:$0xf0] }
  0xdc   :  { %2029 = vmatpush.bf16.msrb.mxu2 %v3331_v49  ;;  %2004 = vmatpush.bf16.msrb.mxu0 %v2787_v59  ;;  %v2688_v33 = vld [vmem:[#allocation2 + $0x30] sm:$0xf0]  ;;  %v4075_v49 = vld [vmem:[#allocation2 + $0x3f4] sm:$0xf0]  ;;  %v1777_v59 = vpop.f32.mrf.mxu2  ;;  %v1790_v1 = vpop.f32.mrf.mxu3 }
  0xdd   :  { %v4014_v37 = vld [vmem:[#allocation2 + $0x214] sm:$0xf]  ;;  %v2691_v48 = vor.u32 %v3950_v32, %v2688_v33  ;;  %v3175_v60 = vor.u32 %v4075_v49, %v3174_v47  ;;  %v2822_v26 = vld [vmem:[#allocation2 + $0x118] sm:$0xf]  ;;  %v3623_v32 = vor.u32 %v4187_v23, %v3622_v22 }
  0xde   :  { %2042 = vmatpush.bf16.msrb.mxu3 %v3587_v53  ;;  %2017 = vmatpush.bf16.msrb.mxu1 %v3043_v61  ;;  %v2944_v38 = vld [vmem:[#allocation2 + $0x230] sm:$0xf0]  ;;  %v3431_v61 = vor.u32 %v4139_v51, %v3430_v50  ;;  %v3987_v28 = vld [vmem:[#allocation2 + $0x134] sm:$0xf0] }
  0xdf   :  { %v4078_v39 = vld [vmem:[#allocation2 + $0x414] sm:$0xf]  ;;  %v2947_v53 = vor.u32 %v4014_v37, %v2944_v38  ;;  %v3078_v29 = vld [vmem:[#allocation2 + $0x318] sm:$0xf]  ;;  %v2823_v38 = vor.u32 %v3987_v28, %v2822_v26 }
  0xe0   :  { %2030 = vmatpush.bf16.msrb.mxu2 %v3299_v62  ;;  %2005 = vmatpush.bf16.msrb.mxu0 %v2755_v11  ;;  %v3200_v42 = vld [vmem:[#allocation2 + $0x430] sm:$0xf0]  ;;  %v2886_v62 = vld [vmem:[#allocation2 + $0x198] sm:$0xf] }
  0xe1   :  { %v4142_v43 = vld [vmem:[#allocation2 + $0x614] sm:$0xf]  ;;  %v3203_v54 = vor.u32 %v4078_v39, %v3200_v42  ;;  %v2887_v10 = vor.u32 %v4003_v63, %v2886_v62  ;;  %v4051_v33 = vld [vmem:[#allocation2 + $0x334] sm:$0xf0] }
  0xe2   :  { %2043 = vmatpush.bf16.msrb.mxu3 %v3555_v3  ;;  %2018 = vmatpush.bf16.msrb.mxu1 %v3011_v13  ;;  %v3456_v44 = vld [vmem:[#allocation2 + $0x630] sm:$0xf0]  ;;  %v4067_v3 = vld [vmem:[#allocation2 + $0x3b4] sm:$0xf0] }
  0xe3   :  { %v3459_v57 = vor.u32 %v4142_v43, %v3456_v44  ;;  %v3143_v11 = vor.u32 %v4067_v3, %v3142_v0  ;;  %v2854_v13 = vld [vmem:[#allocation2 + $0x158] sm:$0xf] }
  0xe4   :  { %2031 = vmatpush.bf16.msrb.mxu2 %v3267_v14  ;;  %2006 = vmatpush.bf16.msrb.mxu0 %v2723_v31  ;;  %v3995_v14 = vld [vmem:[#allocation2 + $0x174] sm:$0xf0]  ;;  %v453_v31 = vperm.slane %v311_v17, 0 }
  0xe5   :  { %v2855_v24 = vor.u32 %v3995_v14, %v2854_v13  ;;  %v4179_v37 = vld [vmem:[#allocation2 + $0x734] sm:$0xf0] }
  0xe6   :  { %2044 = vmatpush.bf16.msrb.mxu3 %v3523_v20  ;;  %2019 = vmatpush.bf16.msrb.mxu1 %v2979_v35  ;;  %v3366_v20 = vld [vmem:[#allocation2 + $0x558] sm:$0xf] }
  0xe7   :  { %v3367_v27 = vor.u32 %v4123_v21, %v3366_v20  ;;  %v4115_v35 = vld [vmem:[#allocation2 + $0x534] sm:$0xf0] }
  0xe8   :  { %2032 = vmatpush.bf16.msrb.mxu2 %v3235_v36  ;;  %2007 = vmatpush.bf16.msrb.mxu0 %v2691_v48  ;;  %v3590_v36 = vld [vmem:[#allocation2 + $0x718] sm:$0xf]  ;;  %v1801_v39 = vpop.f32.mrf.mxu0  ;;  %v3335_v42 = vor.u32 %v4115_v35, %v3334_v34 }
  0xe9   :  { %v2790_v43 = vld [vmem:[#allocation2 + $0xd8] sm:$0xf]  ;;  %v1802_v46 = vadd.f32 %v1801_v39, %v453_v31  ;;  %v3591_v48 = vor.u32 %v4179_v37, %v3590_v36  ;;  %v4007_v39 = vld [vmem:[#allocation2 + $0x1dc] sm:$0xf] }
  0xea   :  { %2045 = vmatpush.bf16.msrb.mxu3 %v3491_v41  ;;  %2020 = vmatpush.bf16.msrb.mxu1 %v2947_v53  ;;  %v3079_v41 = vor.u32 %v4051_v33, %v3078_v29  ;;  %v3979_v44 = vld [vmem:[#allocation2 + $0xf4] sm:$0xf0]  ;;  %v1814_v47 = vpop.f32.mrf.mxu1 }
  0xeb   :  { %2008 = vmatmul.bf16.vlgmr.msrb.gmra.mxu0 %v4366_v9  ;;  %v3046_v45 = vld [vmem:[#allocation2 + $0x2d8] sm:$0xf]  ;;  %v2791_v55 = vor.u32 %v3979_v44, %v2790_v43  ;;  %v3176_v44 = vld [vmem:[#allocation2 + $0x3f8] sm:$0xf0] }
  0xec   :  { %2033 = vmatpush.bf16.msrb.mxu2 %v3203_v54  ;;  %2052 = vmatpush.bf16.msra.mxu0 %v2919_v58  ;;  %v4043_v49 = vld [vmem:[#allocation2 + $0x2f4] sm:$0xf0]  ;;  %v1815_v54 = vadd.f32 %v1814_v47, %v1802_v46  ;;  %v3432_v46 = vld [vmem:[#allocation2 + $0x5f8] sm:$0xf0] }
  0xed   :  { %2021 = vmatmul.bf16.vlgmr.msrb.gmra.mxu1 %v4379_v25  ;;  %v3302_v50 = vld [vmem:[#allocation2 + $0x4d8] sm:$0xf]  ;;  %v3047_v56 = vor.u32 %v4043_v49, %v3046_v45  ;;  %v4135_v45 = vld [vmem:[#allocation2 + $0x5dc] sm:$0xf] }
  0xee   :  { %2046 = vmatpush.bf16.msrb.mxu3 %v3459_v57  ;;  %2065 = vmatpush.bf16.msra.mxu1 %v3175_v60  ;;  %v4107_v51 = vld [vmem:[#allocation2 + $0x4f4] sm:$0xf0]  ;;  %v4199_v49 = vld [vmem:[#allocation2 + $0x7dc] sm:$0xf] }
  0xef   :  { %2034 = vmatmul.bf16.vlgmr.msrb.gmra.mxu2 %v4364_v8  ;;  %v3558_v52 = vld [vmem:[#allocation2 + $0x6d8] sm:$0xf]  ;;  %v3303_v57 = vor.u32 %v4107_v51, %v3302_v50  ;;  %v3688_v50 = vld [vmem:[#allocation2 + $0x7f8] sm:$0xf0] }
  0xf0   :  { %2078 = vmatpush.bf16.msra.mxu2 %v3431_v61  ;;  %2053 = vmatpush.bf16.msra.mxu0 %v2887_v10  ;;  %v4171_v53 = vld [vmem:[#allocation2 + $0x6f4] sm:$0xf0]  ;;  %v1803_v10 = vpop.f32.mrf.mxu0 }
  0xf1   :  { %2047 = vmatmul.bf16.vlgmr.msrb.gmra.mxu3 %v4371_v15  ;;  %v2758_v58 = vld [vmem:[#allocation2 + $0x98] sm:$0xf]  ;;  %v3559_v62 = vor.u32 %v4171_v53, %v3558_v52  ;;  %v3112_v10 = vld [vmem:[#allocation2 + $0x378] sm:$0xf0] }
  0xf2   :  { %2091 = vmatpush.bf16.msra.mxu3 %v3687_v2  ;;  %2066 = vmatpush.bf16.msra.mxu1 %v3143_v11  ;;  %v3971_v59 = vld [vmem:[#allocation2 + $0xb4] sm:$0xf0]  ;;  %v1827_v61 = vpop.f32.mrf.mxu2  ;;  %v1816_v17 = vpop.f32.mrf.mxu1 }
  0xf3   :  { %v3014_v60 = vld [vmem:[#allocation2 + $0x298] sm:$0xf]  ;;  %v1828_v2 = vadd.f32 %v1827_v61, %v1815_v54  ;;  %v2759_v6 = vor.u32 %v3971_v59, %v2758_v58  ;;  %v3435_v54 = vor.u32 %v4135_v45, %v3432_v46  ;;  %v3691_v58 = vor.u32 %v4199_v49, %v3688_v50  ;;  %v3144_v59 = vld [vmem:[#allocation2 + $0x3b8] sm:$0xf0] }
  0xf4   :  { %2079 = vmatpush.bf16.msra.mxu2 %v3399_v12  ;;  %2054 = vmatpush.bf16.msra.mxu0 %v2855_v24  ;;  %v4035_v63 = vld [vmem:[#allocation2 + $0x2b4] sm:$0xf0]  ;;  %v1840_v3 = vpop.f32.mrf.mxu3  ;;  %v3400_v61 = vld [vmem:[#allocation2 + $0x5b8] sm:$0xf0] }
  0xf5   :  { %v3270_v0 = vld [vmem:[#allocation2 + $0x498] sm:$0xf]  ;;  %v4408_v7 = vadd.f32 %v1840_v3, %v1828_v2  ;;  %v3015_v11 = vor.u32 %v4035_v63, %v3014_v60  ;;  %v4127_v60 = vld [vmem:[#allocation2 + $0x59c] sm:$0xf] }
  0xf6   :  { %2092 = vmatpush.bf16.msra.mxu3 %v3655_v18  ;;  %2067 = vmatpush.bf16.msra.mxu1 %v3111_v30  ;;  %v4099_v1 = vld [vmem:[#allocation2 + $0x4b4] sm:$0xf0]  ;;  %v3656_v63 = vld [vmem:[#allocation2 + $0x7b8] sm:$0xf0]  ;;  %v3403_v2 = vor.u32 %v4127_v60, %v3400_v61 }
  0xf7   :  { %v4163_v5 = vld [vmem:[#allocation2 + $0x6b4] sm:$0xf0]  ;;  %v3271_v12 = vor.u32 %v4099_v1, %v3270_v0  ;;  %v3991_v3 = vld [vmem:[#allocation2 + $0x15c] sm:$0xf] }
  0xf8   :  { %2080 = vmatpush.bf16.msra.mxu2 %v3367_v27  ;;  %2055 = vmatpush.bf16.msra.mxu0 %v2823_v38  ;;  %v2726_v13 = vld [vmem:[#allocation2 + $0x58] sm:$0xf]  ;;  %v3527_v18 = vor.u32 %v4163_v5, %v3526_v4  ;;  %v2856_v4 = vld [vmem:[#allocation2 + $0x178] sm:$0xf0] }
  0xf9   :  { %v3963_v14 = vld [vmem:[#allocation2 + $0x74] sm:$0xf0]  ;;  %v4055_v5 = vld [vmem:[#allocation2 + $0x35c] sm:$0xf] }
  0xfa   :  { %2093 = vmatpush.bf16.msra.mxu3 %v3623_v32  ;;  %2068 = vmatpush.bf16.msra.mxu1 %v3079_v41  ;;  %v2982_v16 = vld [vmem:[#allocation2 + $0x258] sm:$0xf]  ;;  %v2727_v24 = vor.u32 %v3963_v14, %v2726_v13  ;;  %v1829_v33 = vpop.f32.mrf.mxu2  ;;  %v2920_v41 = vld [vmem:[#allocation2 + $0x1f8] sm:$0xf0]  ;;  %v3115_v17 = vor.u32 %v4055_v5, %v3112_v10 }
  0xfb   :  { %v4027_v19 = vld [vmem:[#allocation2 + $0x274] sm:$0xf0]  ;;  %v2923_v52 = vor.u32 %v4007_v39, %v2920_v41  ;;  %v4183_v13 = vld [vmem:[#allocation2 + $0x75c] sm:$0xf] }
  0xfc   :  { %2081 = vmatpush.bf16.msra.mxu2 %v3335_v42  ;;  %2056 = vmatpush.bf16.msra.mxu0 %v2791_v55  ;;  %v3238_v20 = vld [vmem:[#allocation2 + $0x458] sm:$0xf]  ;;  %v2983_v27 = vor.u32 %v4027_v19, %v2982_v16  ;;  %v1842_v38 = vpop.f32.mrf.mxu3  ;;  %v4071_v42 = vld [vmem:[#allocation2 + $0x3dc] sm:$0xf]  ;;  %v2859_v16 = vor.u32 %v3991_v3, %v2856_v4 }
  0xfd   :  { %v4091_v21 = vld [vmem:[#allocation2 + $0x474] sm:$0xf0]  ;;  %v3179_v53 = vor.u32 %v4071_v42, %v3176_v44  ;;  %v3999_v55 = vld [vmem:[#allocation2 + $0x19c] sm:$0xf] }
  0xfe   :  { %2094 = vmatpush.bf16.msra.mxu3 %v3591_v48  ;;  %2069 = vmatpush.bf16.msra.mxu1 %v3047_v56  ;;  %v3494_v22 = vld [vmem:[#allocation2 + $0x658] sm:$0xf]  ;;  %v3239_v28 = vor.u32 %v4091_v21, %v3238_v20  ;;  %v2888_v56 = vld [vmem:[#allocation2 + $0x1b8] sm:$0xf0] }
  0xff   :  { %v4155_v23 = vld [vmem:[#allocation2 + $0x674] sm:$0xf0]  ;;  %v2891_v0 = vor.u32 %v3999_v55, %v2888_v56  ;;  %v3624_v14 = vld [vmem:[#allocation2 + $0x778] sm:$0xf0] }
 0x100   :  { %2082 = vmatpush.bf16.msra.mxu2 %v3303_v57  ;;  %2057 = vmatpush.bf16.msra.mxu0 %v2759_v6  ;;  %v2694_v26 = vld [vmem:[#allocation2 + $0x18] sm:$0xf]  ;;  %v3495_v34 = vor.u32 %v4155_v23, %v3494_v22  ;;  %v4063_v57 = vld [vmem:[#allocation2 + $0x39c] sm:$0xf]  ;;  %v3627_v22 = vor.u32 %v4183_v13, %v3624_v14 }
 0x101   :  { %v3955_v30 = vld [vmem:[#allocation2 + $0x34] sm:$0xf0]  ;;  %v3147_v1 = vor.u32 %v4063_v57, %v3144_v59  ;;  %v3983_v19 = vld [vmem:[#allocation2 + $0x11c] sm:$0xf] }
 0x102   :  { %2095 = vmatpush.bf16.msra.mxu3 %v3559_v62  ;;  %2070 = vmatpush.bf16.msra.mxu1 %v3015_v11  ;;  %v2950_v29 = vld [vmem:[#allocation2 + $0x218] sm:$0xf]  ;;  %v2695_v43 = vor.u32 %v3955_v30, %v2694_v26  ;;  %v4191_v62 = vld [vmem:[#allocation2 + $0x79c] sm:$0xf] }
 0x103   :  { %v4019_v31 = vld [vmem:[#allocation2 + $0x234] sm:$0xf0]  ;;  %v3659_v6 = vor.u32 %v4191_v62, %v3656_v63  ;;  %v4119_v11 = vld [vmem:[#allocation2 + $0x55c] sm:$0xf] }
 0x104   :  { %2083 = vmatpush.bf16.msra.mxu2 %v3271_v12  ;;  %v3206_v32 = vld [vmem:[#allocation2 + $0x418] sm:$0xf]  ;;  %2058 = vmatpush.bf16.msra.mxu0 %v2727_v24  ;;  %v2951_v47 = vor.u32 %v4019_v31, %v2950_v29  ;;  %v3368_v12 = vld [vmem:[#allocation2 + $0x578] sm:$0xf0] }
 0x105   :  { %v4083_v35 = vld [vmem:[#allocation2 + $0x434] sm:$0xf0]  ;;  %v2824_v20 = vld [vmem:[#allocation2 + $0x138] sm:$0xf0] }
 0x106   :  { %2096 = vmatpush.bf16.msra.mxu3 %v3527_v18  ;;  %v3462_v36 = vld [vmem:[#allocation2 + $0x618] sm:$0xf]  ;;  %2071 = vmatpush.bf16.msra.mxu1 %v2983_v27  ;;  %v3207_v48 = vor.u32 %v4083_v35, %v3206_v32  ;;  %v3371_v18 = vor.u32 %v4119_v11, %v3368_v12  ;;  %v4047_v21 = vld [vmem:[#allocation2 + $0x31c] sm:$0xf] }
 0x107   :  { %v4147_v37 = vld [vmem:[#allocation2 + $0x634] sm:$0xf0]  ;;  %v3080_v23 = vld [vmem:[#allocation2 + $0x338] sm:$0xf0] }
 0x108   :  { %2084 = vmatpush.bf16.msra.mxu2 %v3239_v28  ;;  %v3463_v51 = vor.u32 %v4147_v37, %v3462_v36  ;;  %2059 = vmatpush.bf16.msra.mxu0 %v2695_v43  ;;  %v4111_v24 = vld [vmem:[#allocation2 + $0x51c] sm:$0xf]  ;;  %v2827_v28 = vor.u32 %v3983_v19, %v2824_v20  ;;  %v4414_v29 = vpop.f32.mrf.mxu0  ;;  %v3083_v31 = vor.u32 %v4047_v21, %v3080_v23 }
 0x109   :  { %v3336_v26 = vld [vmem:[#allocation2 + $0x538] sm:$0xf0] }
 0x10a   :  { %2097 = vmatpush.bf16.msra.mxu3 %v3495_v34  ;;  %2072 = vmatpush.bf16.msra.mxu1 %v2951_v47  ;;  %v4175_v30 = vld [vmem:[#allocation2 + $0x71c] sm:$0xf]  ;;  %v3339_v32 = vor.u32 %v4111_v24, %v3336_v26  ;;  %v4416_v36 = vpop.f32.mrf.mxu1 }
 0x10b   :  { %2060 = vmatmul.bf16.vlgmr.msra.gmra.mxu0 %v4366_v9  ;;  %v3592_v27 = vld [vmem:[#allocation2 + $0x738] sm:$0xf0] }
 0x10c   :  { %2085 = vmatpush.bf16.msra.mxu2 %v3207_v48  ;;  %2104 = vmatpush.bf16.msrb.mxu0 %v2923_v52  ;;  %v3975_v33 = vld [vmem:[#allocation2 + $0xdc] sm:$0xf]  ;;  %v3595_v37 = vor.u32 %v4175_v30, %v3592_v27 }
 0x10d   :  { %2073 = vmatmul.bf16.vlgmr.msra.gmra.mxu1 %v4379_v25  ;;  %v2792_v34 = vld [vmem:[#allocation2 + $0xf8] sm:$0xf0] }
 0x10e   :  { %2098 = vmatpush.bf16.msra.mxu3 %v3463_v51  ;;  %2117 = vmatpush.bf16.msrb.mxu1 %v3179_v53  ;;  %v4039_v35 = vld [vmem:[#allocation2 + $0x2dc] sm:$0xf]  ;;  %v2795_v44 = vor.u32 %v3975_v33, %v2792_v34 }
 0x10f   :  { %2086 = vmatmul.bf16.vlgmr.msra.gmra.mxu2 %v4364_v8  ;;  %v3048_v38 = vld [vmem:[#allocation2 + $0x2f8] sm:$0xf0] }
 0x110   :  { %2130 = vmatpush.bf16.msrb.mxu2 %v3435_v54  ;;  %2105 = vmatpush.bf16.msrb.mxu0 %v2891_v0  ;;  %v4103_v39 = vld [vmem:[#allocation2 + $0x4dc] sm:$0xf]  ;;  %v3051_v45 = vor.u32 %v4039_v35, %v3048_v38  ;;  %v1855_v59 = vpop.f32.mrf.mxu0  ;;  %v4210_v38 = vld [vmem:[#allocation4 + $0x30] sm:$0xff] }
 0x111   :  { %2099 = vmatmul.bf16.vlgmr.msra.gmra.mxu3 %v4371_v15  ;;  %v3304_v41 = vld [vmem:[#allocation2 + $0x4f8] sm:$0xf0] }
 0x112   :  { %2143 = vmatpush.bf16.msrb.mxu3 %v3691_v58  ;;  %2118 = vmatpush.bf16.msrb.mxu1 %v3147_v1  ;;  %v4167_v42 = vld [vmem:[#allocation2 + $0x6dc] sm:$0xf]  ;;  %v3307_v46 = vor.u32 %v4103_v39, %v3304_v41  ;;  %v4418_v50 = vpop.f32.mrf.mxu2  ;;  %v1868_v1 = vpop.f32.mrf.mxu1  ;;  %v4218_v39 = vld [vmem:[#allocation4 + $0x70] sm:$0xff] }
 0x113   :  { %v3560_v43 = vld [vmem:[#allocation2 + $0x6f8] sm:$0xf0]  ;;  %v4226_v41 = vld [vmem:[#allocation4 + $0xb0] sm:$0xff] }
 0x114   :  { %2131 = vmatpush.bf16.msrb.mxu2 %v3403_v2  ;;  %2106 = vmatpush.bf16.msrb.mxu0 %v2859_v16  ;;  %v3967_v47 = vld [vmem:[#allocation2 + $0x9c] sm:$0xf]  ;;  %v3563_v51 = vor.u32 %v4167_v42, %v3560_v43  ;;  %v4420_v55 = vpop.f32.mrf.mxu3  ;;  %v4206_v1 = vld [vmem:[#allocation4 + $0x10] sm:$0xff] }
 0x115   :  { %v2760_v48 = vld [vmem:[#allocation2 + $0xb8] sm:$0xf0] }
 0x116   :  { %2144 = vmatpush.bf16.msrb.mxu3 %v3659_v6  ;;  %2119 = vmatpush.bf16.msrb.mxu1 %v3115_v17  ;;  %v4031_v49 = vld [vmem:[#allocation2 + $0x29c] sm:$0xf]  ;;  %v2763_v58 = vor.u32 %v3967_v47, %v2760_v48  ;;  %v4225_v47 = vld [vmem:[#allocation4 + $0xa8] sm:$0xff] }
 0x117   :  { %v3016_v52 = vld [vmem:[#allocation2 + $0x2b8] sm:$0xf0] }
 0x118   :  { %2132 = vmatpush.bf16.msrb.mxu2 %v3371_v18  ;;  %2107 = vmatpush.bf16.msrb.mxu0 %v2827_v28  ;;  %v4095_v53 = vld [vmem:[#allocation2 + $0x49c] sm:$0xf]  ;;  %v3019_v60 = vor.u32 %v4031_v49, %v3016_v52 }
 0x119   :  { %v3272_v54 = vld [vmem:[#allocation2 + $0x4b8] sm:$0xf0] }
 0x11a   :  { %2145 = vmatpush.bf16.msrb.mxu3 %v3627_v22  ;;  %2120 = vmatpush.bf16.msrb.mxu1 %v3083_v31  ;;  %v4159_v56 = vld [vmem:[#allocation2 + $0x69c] sm:$0xf]  ;;  %v3275_v61 = vor.u32 %v4095_v53, %v3272_v54  ;;  %v1881_v18 = vpop.f32.mrf.mxu2 }
 0x11b   :  { %v3528_v57 = vld [vmem:[#allocation2 + $0x6b8] sm:$0xf0]  ;;  %v4229_v18 = vld [vmem:[#allocation4 + $0xc8] sm:$0xff] }
 0x11c   :  { %2133 = vmatpush.bf16.msrb.mxu2 %v3339_v32  ;;  %2108 = vmatpush.bf16.msrb.mxu0 %v2795_v44  ;;  %v3959_v62 = vld [vmem:[#allocation2 + $0x5c] sm:$0xf]  ;;  %v3531_v2 = vor.u32 %v4159_v56, %v3528_v57  ;;  %v1894_v23 = vpop.f32.mrf.mxu3  ;;  %v4234_v44 = vld [vmem:[#allocation4 + $0xf0] sm:$0xff]  ;;  %v4232_v56 = vld [vmem:[#allocation4 + $0xe0] sm:$0xff] }
 0x11d   :  { %v2728_v63 = vld [vmem:[#allocation2 + $0x78] sm:$0xf0] }
 0x11e   :  { %2146 = vmatpush.bf16.msrb.mxu3 %v3595_v37  ;;  %2121 = vmatpush.bf16.msrb.mxu1 %v3051_v45  ;;  %v4023_v0 = vld [vmem:[#allocation2 + $0x25c] sm:$0xf]  ;;  %v2731_v11 = vor.u32 %v3959_v62, %v2728_v63  ;;  %v307_v37 = vld [vmem:[#allocation2 + $0x808] sm:$0x11] }
 0x11f   :  { %v2984_v3 = vld [vmem:[#allocation2 + $0x278] sm:$0xf0]  ;;  %v312_v42 = vunpack.c.l.bf16 %v307_v37  ;;  %v313_v43 = vunpack.c.h.bf16 %v307_v37  ;;  %v4209_v45 = vld [vmem:[#allocation4 + $0x28] sm:$0xff] }
 0x120   :  { %2134 = vmatpush.bf16.msrb.mxu2 %v3307_v46  ;;  %v4087_v4 = vld [vmem:[#allocation2 + $0x45c] sm:$0xf]  ;;  %2109 = vmatpush.bf16.msrb.mxu0 %v2763_v58  ;;  %v2987_v12 = vor.u32 %v4023_v0, %v2984_v3  ;;  %v4217_v46 = vld [vmem:[#allocation4 + $0x68] sm:$0xff]  ;;  %v4222_v3 = vld [vmem:[#allocation4 + $0x90] sm:$0xff] }
 0x121   :  { %v3240_v5 = vld [vmem:[#allocation2 + $0x478] sm:$0xf0]  ;;  %v454_v48 = vperm.slane %v312_v42, 0  ;;  %v455_v49 = vperm.slane %v313_v43, 0  ;;  %v4249_v37 = vld [vmem:[#allocation4 + $0x168] sm:$0xff]  ;;  %v4248_v42 = vld [vmem:[#allocation4 + $0x160] sm:$0xff] }
 0x122   :  { %2147 = vmatpush.bf16.msrb.mxu3 %v3563_v51  ;;  %v4151_v6 = vld [vmem:[#allocation2 + $0x65c] sm:$0xf]  ;;  %2122 = vmatpush.bf16.msrb.mxu1 %v3019_v60  ;;  %v3243_v13 = vor.u32 %v4087_v4, %v3240_v5 }
 0x123   :  { %v3496_v10 = vld [vmem:[#allocation2 + $0x678] sm:$0xf0]  ;;  %v1854_v53 = vadd.f32 %v4414_v29, %v454_v48  ;;  %v4214_v29 = vld [vmem:[#allocation4 + $0x50] sm:$0xff] }
 0x124   :  { %2135 = vmatpush.bf16.msrb.mxu2 %v3275_v61  ;;  %v3951_v14 = vld [vmem:[#allocation2 + $0x1c] sm:$0xf]  ;;  %v3499_v19 = vor.u32 %v4151_v6, %v3496_v10  ;;  %2110 = vmatpush.bf16.msrb.mxu0 %v2731_v11  ;;  %v4230_v10 = vld [vmem:[#allocation4 + $0xd0] sm:$0xff]  ;;  %v4205_v11 = vld [vmem:[#allocation4 + $0x8] sm:$0xff] }
 0x125   :  { %v2696_v16 = vld [vmem:[#allocation2 + $0x38] sm:$0xf0]  ;;  %v1867_v62 = vadd.f32 %v4416_v36, %v1854_v53  ;;  %v4213_v36 = vld [vmem:[#allocation4 + $0x48] sm:$0xff] }
 0x126   :  { %v4015_v17 = vld [vmem:[#allocation2 + $0x21c] sm:$0xf]  ;;  %2148 = vmatpush.bf16.msrb.mxu3 %v3531_v2  ;;  %v2699_v30 = vor.u32 %v3951_v14, %v2696_v16  ;;  %2123 = vmatpush.bf16.msrb.mxu1 %v2987_v12  ;;  %v4221_v12 = vld [vmem:[#allocation4 + $0x88] sm:$0xff] }
 0x127   :  { %v2952_v20 = vld [vmem:[#allocation2 + $0x238] sm:$0xf0]  ;;  %v1880_v5 = vadd.f32 %v4418_v50, %v1867_v62  ;;  %v2156_v50 = vmax.f32 %v4401_v40, 0.0  ;;  %v4242_v40 = vld [vmem:[#allocation4 + $0x130] sm:$0xff]  ;;  %v4244_v62 = vld [vmem:[#allocation4 + $0x140] sm:$0xff] }
 0x128   :  { %v4079_v21 = vld [vmem:[#allocation2 + $0x41c] sm:$0xf]  ;;  %2136 = vmatpush.bf16.msrb.mxu2 %v3243_v13  ;;  %v2955_v27 = vor.u32 %v4015_v17, %v2952_v20  ;;  %2111 = vmatpush.bf16.msrb.mxu0 %v2699_v30  ;;  %v1905_v51 = vpop.f32.mrf.mxu0  ;;  %v4212_v20 = vld [vmem:[#allocation4 + $0x40] sm:$0xff] }
 0x129   :  { %v3208_v22 = vld [vmem:[#allocation2 + $0x438] sm:$0xf0]  ;;  %v1906_v54 = vadd.f32 %v1905_v51, %v455_v49  ;;  %v1893_v16 = vadd.f32 %v4420_v55, %v1880_v5  ;;  %v4228_v55 = vld [vmem:[#allocation4 + $0xc0] sm:$0xff] }
 0x12a   :  { %v4143_v24 = vld [vmem:[#allocation2 + $0x61c] sm:$0xf]  ;;  %v3211_v28 = vor.u32 %v4079_v21, %v3208_v22  ;;  %2149 = vmatpush.bf16.msrb.mxu3 %v3499_v19  ;;  %2124 = vmatpush.bf16.msrb.mxu1 %v2955_v27  ;;  %v1918_v52 = vpop.f32.mrf.mxu1  ;;  %v4204_v19 = vld [vmem:[#allocation4] sm:$0xff]  ;;  %v2157_v22 = vmax.f32 %v4408_v7, 0.0  ;;  %v4432_v27 = vld [vmem:[#allocation2 + $0x810] sm:$0x11] }
 0x12b   :  { %v3464_v26 = vld [vmem:[#allocation2 + $0x638] sm:$0xf0]  ;;  %2112 = vmatmul.bf16.vlgmr.msrb.gmra.mxu0 %v4366_v9  ;;  %v4233_v9 = vld [vmem:[#allocation4 + $0xe8] sm:$0xff]  ;;  %v1919_v63 = vadd.f32 %v1918_v52, %v1906_v54  ;;  %v4220_v21 = vld [vmem:[#allocation4 + $0x80] sm:$0xff]  ;;  %v314_v7 = vunpack.c.l.bf16 %v4432_v27 }
 0x12c   :  { %v3467_v31 = vor.u32 %v4143_v24, %v3464_v26  ;;  %v4211_v32 = vld [vmem:[#allocation4 + $0x38] sm:$0xff]  ;;  %2137 = vmatpush.bf16.msrb.mxu2 %v3211_v28  ;;  %v2158_v26 = vmax.f32 %v1893_v16, 0.0  ;;  %v2164_v28 = vpack.c.bf16 %v2156_v50, %v2156_v50  ;;  %v4237_v54 = vld [vmem:[#allocation4 + $0x108] sm:$0xff]  ;;  %v4252_v50 = vld [vmem:[#allocation4 + $0x180] sm:$0xff] }
 0x12d   :  { %v4219_v33 = vld [vmem:[#allocation4 + $0x78] sm:$0xff]  ;;  %2557 = vmatpush.bf16.msra.mxu0 %v4211_v32  ;;  %2125 = vmatmul.bf16.vlgmr.msrb.gmra.mxu1 %v4379_v25  ;;  %v4208_v25 = vld [vmem:[#allocation4 + $0x20] sm:$0xff]  ;;  %v4250_v32 = vld [vmem:[#allocation4 + $0x170] sm:$0xff] }
 0x12e   :  { %v4227_v34 = vld [vmem:[#allocation4 + $0xb8] sm:$0xff]  ;;  %2150 = vmatpush.bf16.msrb.mxu3 %v3467_v31  ;;  %2570 = vmatpush.bf16.msra.mxu1 %v4219_v33  ;;  %v2165_v31 = vpack.c.bf16 %v2157_v22, %v2157_v22  ;;  %v2166_v33 = vpack.c.bf16 %v2158_v26, %v2158_v26  ;;  %v4266_v22 = vld [vmem:[#allocation4 + $0x1f0] sm:$0xff]  ;;  %v4265_v26 = vld [vmem:[#allocation4 + $0x1e8] sm:$0xff] }
 0x12f   :  { %v4235_v35 = vld [vmem:[#allocation4 + $0xf8] sm:$0xff]  ;;  %2138 = vmatmul.bf16.vlgmr.msrb.gmra.mxu2 %v4364_v8  ;;  %v4216_v8 = vld [vmem:[#allocation4 + $0x60] sm:$0xff] }
 0x130   :  { %2583 = vmatpush.bf16.msra.mxu2 %v4227_v34  ;;  %v4207_v57 = vld [vmem:[#allocation4 + $0x18] sm:$0xff]  ;;  %v1907_v2 = vpop.f32.mrf.mxu0 }
 0x131   :  { %2151 = vmatmul.bf16.vlgmr.msrb.gmra.mxu3 %v4371_v15  ;;  %2558 = vmatpush.bf16.msra.mxu0 %v4210_v38  ;;  %v4224_v15 = vld [vmem:[#allocation4 + $0xa0] sm:$0xff]  ;;  %v4215_v58 = vld [vmem:[#allocation4 + $0x58] sm:$0xff]  ;;  %v456_v38 = vperm.slane %v314_v7, 0  ;;  %v315_v2 = vunpack.c.h.bf16 %v4432_v27 }
 0x132   :  { %2596 = vmatpush.bf16.msra.mxu3 %v4235_v35  ;;  %2571 = vmatpush.bf16.msra.mxu1 %v4218_v39  ;;  %v4223_v59 = vld [vmem:[#allocation4 + $0x98] sm:$0xff]  ;;  %v1931_v60 = vpop.f32.mrf.mxu2  ;;  %v1920_v4 = vpop.f32.mrf.mxu1  ;;  %v4241_v35 = vld [vmem:[#allocation4 + $0x128] sm:$0xff]  ;;  %v4240_v39 = vld [vmem:[#allocation4 + $0x120] sm:$0xff] }
 0x133   :  { %v4231_v0 = vld [vmem:[#allocation4 + $0xd8] sm:$0xff]  ;;  %v1932_v6 = vadd.f32 %v1931_v60, %v1919_v63  ;;  %v4257_v63 = vld [vmem:[#allocation4 + $0x1a8] sm:$0xff] }
 0x134   :  { %2584 = vmatpush.bf16.msra.mxu2 %v4226_v41  ;;  %v1944_v61 = vpop.f32.mrf.mxu3  ;;  %v4243_v23 = vld [vmem:[#allocation4 + $0x138] sm:$0xff] }
 0x135   :  { %2559 = vmatpush.bf16.msra.mxu0 %v4209_v45  ;;  %v1945_v17 = vadd.f32 %v1944_v61, %v1932_v6  ;;  %v4251_v24 = vld [vmem:[#allocation4 + $0x178] sm:$0xff]  ;;  %v4236_v61 = vld [vmem:[#allocation4 + $0x100] sm:$0xff] }
 0x136   :  { %2597 = vmatpush.bf16.msra.mxu3 %v4234_v44  ;;  %2572 = vmatpush.bf16.msra.mxu1 %v4217_v46  ;;  %v4239_v46 = vld [vmem:[#allocation4 + $0x118] sm:$0xff] }
 0x137   :  { %v2159_v30 = vmax.f32 %v1945_v17, 0.0  ;;  %v4259_v52 = vld [vmem:[#allocation4 + $0x1b8] sm:$0xff] }
 0x138   :  { %2585 = vmatpush.bf16.msra.mxu2 %v4225_v47  ;;  %v4247_v47 = vld [vmem:[#allocation4 + $0x158] sm:$0xff] }
 0x139   :  { %2560 = vmatpush.bf16.msra.mxu0 %v4208_v25  ;;  %v2167_v34 = vpack.c.bf16 %v2159_v30, %v2159_v30  ;;  %v4238_v25 = vld [vmem:[#allocation4 + $0x110] sm:$0xff]  ;;  %v309_v30 = vld [vmem:[#allocation2 + $0x818] sm:$0x11] }
 0x13a   :  { %2598 = vmatpush.bf16.msra.mxu3 %v4233_v9  ;;  %2573 = vmatpush.bf16.msra.mxu1 %v4216_v8  ;;  %v1933_v13 = vpop.f32.mrf.mxu2  ;;  %v4246_v8 = vld [vmem:[#allocation4 + $0x150] sm:$0xff]  ;;  %v316_v27 = vunpack.c.l.bf16 %v309_v30 }
 0x13c   :  { %2586 = vmatpush.bf16.msra.mxu2 %v4224_v15  ;;  %v1946_v14 = vpop.f32.mrf.mxu3 }
 0x13d   :  { %2561 = vmatpush.bf16.msra.mxu0 %v4207_v57  ;;  %v4253_v14 = vld [vmem:[#allocation4 + $0x188] sm:$0xff] }
 0x13e   :  { %2599 = vmatpush.bf16.msra.mxu3 %v4232_v56  ;;  %2574 = vmatpush.bf16.msra.mxu1 %v4215_v58  ;;  %v4245_v56 = vld [vmem:[#allocation4 + $0x148] sm:$0xff]  ;;  %v4258_v58 = vld [vmem:[#allocation4 + $0x1b0] sm:$0xff] }
 0x140   :  { %2587 = vmatpush.bf16.msra.mxu2 %v4223_v59 }
 0x141   :  { %2562 = vmatpush.bf16.msra.mxu0 %v4206_v1  ;;  %v4256_v1 = vld [vmem:[#allocation4 + $0x1a0] sm:$0xff] }
 0x142   :  { %2600 = vmatpush.bf16.msra.mxu3 %v4231_v0  ;;  %2575 = vmatpush.bf16.msra.mxu1 %v4214_v29  ;;  %v4255_v29 = vld [vmem:[#allocation4 + $0x198] sm:$0xff] }
 0x144   :  { %2588 = vmatpush.bf16.msra.mxu2 %v4222_v3  ;;  %v457_v3 = vperm.slane %v315_v2, 0 }
 0x145   :  { %2563 = vmatpush.bf16.msra.mxu0 %v4205_v11 }
 0x146   :  { %2601 = vmatpush.bf16.msra.mxu3 %v4230_v10  ;;  %2576 = vmatpush.bf16.msra.mxu1 %v4213_v36  ;;  %v4254_v10 = vld [vmem:[#allocation4 + $0x190] sm:$0xff] }
 0x148   :  { %2589 = vmatpush.bf16.msra.mxu2 %v4221_v12  ;;  %v1957_v41 = vpop.f32.mrf.mxu0 }
 0x149   :  { %2564 = vmatpush.bf16.msra.mxu0 %v4204_v19  ;;  %v1958_v43 = vadd.f32 %v1957_v41, %v456_v38 }
 0x14a   :  { %2602 = vmatpush.bf16.msra.mxu3 %v4229_v18  ;;  %2577 = vmatpush.bf16.msra.mxu1 %v4212_v20  ;;  %v1970_v44 = vpop.f32.mrf.mxu1  ;;  %v4267_v20 = vld [vmem:[#allocation4 + $0x1f8] sm:$0xff] }
 0x14b   :  { %v1971_v45 = vadd.f32 %v1970_v44, %v1958_v43  ;;  %v4260_v44 = vld [vmem:[#allocation4 + $0x1c0] sm:$0xff] }
 0x14c   :  { %2590 = vmatpush.bf16.msra.mxu2 %v4220_v21  ;;  %2565 = vmatmul.bf16.vlgmr.msra.gmra.mxu0 %v2164_v28  ;;  %v458_v28 = vperm.slane %v316_v27, 0 }
 0x14d   :  { %2609 = vmatpush.bf16.msrb.mxu0 %v4243_v23  ;;  %2578 = vmatmul.bf16.vlgmr.msra.gmra.mxu1 %v2165_v31  ;;  %v4263_v31 = vld [vmem:[#allocation4 + $0x1d8] sm:$0xff] }
 0x14e   :  { %2622 = vmatpush.bf16.msrb.mxu1 %v4251_v24  ;;  %2603 = vmatpush.bf16.msra.mxu3 %v4228_v55  ;;  %v4264_v55 = vld [vmem:[#allocation4 + $0x1e0] sm:$0xff] }
 0x14f   :  { %2591 = vmatmul.bf16.vlgmr.msra.gmra.mxu2 %v2166_v33 }
 0x150   :  { %v1959_v51 = vpop.f32.mrf.mxu0  ;;  %2635 = vmatpush.bf16.msrb.mxu2 %v4259_v52 }
 0x151   :  { %2610 = vmatpush.bf16.msrb.mxu0 %v4242_v40  ;;  %2604 = vmatmul.bf16.vlgmr.msra.gmra.mxu3 %v2167_v34 }
 0x152   :  { %2623 = vmatpush.bf16.msrb.mxu1 %v4250_v32  ;;  %v1983_v48 = vpop.f32.mrf.mxu2  ;;  %v1972_v15 = vpop.f32.mrf.mxu1  ;;  %2648 = vmatpush.bf16.msrb.mxu3 %v4267_v20  ;;  %v4262_v32 = vld [vmem:[#allocation4 + $0x1d0] sm:$0xff] }
 0x153   :  { %v1984_v9 = vadd.f32 %v1983_v48, %v1971_v45 }
 0x154   :  { %v1996_v49 = vpop.f32.mrf.mxu3  ;;  %2636 = vmatpush.bf16.msrb.mxu2 %v4258_v58 }
 0x155   :  { %2611 = vmatpush.bf16.msrb.mxu0 %v4241_v35  ;;  %v1997_v53 = vadd.f32 %v1996_v49, %v1984_v9  ;;  %v317_v49 = vunpack.c.h.bf16 %v309_v30 }
 0x156   :  { %2624 = vmatpush.bf16.msrb.mxu1 %v4249_v37  ;;  %2649 = vmatpush.bf16.msrb.mxu3 %v4266_v22  ;;  %v4261_v37 = vld [vmem:[#allocation4 + $0x1c8] sm:$0xff] }
 0x157   :  { %v2160_v60 = vmax.f32 %v1997_v53, 0.0  ;;  %v459_v9 = vperm.slane %v317_v49, 0 }
 0x158   :  { %2637 = vmatpush.bf16.msrb.mxu2 %v4257_v63  ;;  %v446_v63 = vld [vmem:[#allocation4 + $0x200] sm:$0x1] }
 0x159   :  { %2612 = vmatpush.bf16.msrb.mxu0 %v4240_v39  ;;  %v2168_v0 = vpack.c.bf16 %v2160_v60, %v2160_v60 }
 0x15a   :  { %2625 = vmatpush.bf16.msrb.mxu1 %v4248_v42  ;;  %v1985_v57 = vpop.f32.mrf.mxu2  ;;  %2650 = vmatpush.bf16.msrb.mxu3 %v4265_v26 }
 0x15c   :  { %v1998_v59 = vpop.f32.mrf.mxu3  ;;  %2638 = vmatpush.bf16.msrb.mxu2 %v4256_v1 }
 0x15d   :  { %2613 = vmatpush.bf16.msrb.mxu0 %v4239_v46 }
 0x15e   :  { %2626 = vmatpush.bf16.msrb.mxu1 %v4247_v47  ;;  %2651 = vmatpush.bf16.msrb.mxu3 %v4264_v55 }
 0x160   :  { %2639 = vmatpush.bf16.msrb.mxu2 %v4255_v29 }
 0x161   :  { %2614 = vmatpush.bf16.msrb.mxu0 %v4238_v25 }
 0x162   :  { %2627 = vmatpush.bf16.msrb.mxu1 %v4246_v8  ;;  %2652 = vmatpush.bf16.msrb.mxu3 %v4263_v31 }
 0x164   :  { %2640 = vmatpush.bf16.msrb.mxu2 %v4254_v10 }
 0x165   :  { %2615 = vmatpush.bf16.msrb.mxu0 %v4237_v54 }
 0x166   :  { %2628 = vmatpush.bf16.msrb.mxu1 %v4245_v56  ;;  %2653 = vmatpush.bf16.msrb.mxu3 %v4262_v32 }
 0x168   :  { %v2009_v4 = vpop.f32.mrf.mxu0  ;;  %2641 = vmatpush.bf16.msrb.mxu2 %v4253_v14 }
 0x169   :  { %2616 = vmatpush.bf16.msrb.mxu0 %v4236_v61  ;;  %v2010_v5 = vadd.f32 %v2009_v4, %v457_v3 }
 0x16a   :  { %2629 = vmatpush.bf16.msrb.mxu1 %v4244_v62  ;;  %v2022_v6 = vpop.f32.mrf.mxu1  ;;  %2654 = vmatpush.bf16.msrb.mxu3 %v4261_v37 }
 0x16b   :  { %v2023_v11 = vadd.f32 %v2022_v6, %v2010_v5 }
 0x16c   :  { %2617 = vmatmul.bf16.vlgmr.msrb.gmra.mxu0 %v2168_v0  ;;  %2642 = vmatpush.bf16.msrb.mxu2 %v4252_v50  ;;  %v447_v0 = vunpack.c.l.bf16 %v446_v63 }
 0x16e   :  { %2655 = vmatpush.bf16.msrb.mxu3 %v4260_v44  ;;  %v2172_v1 = vperm.slane %v447_v0, 0 }
 0x170   :  { %v2011_v17 = vpop.f32.mrf.mxu0 }
 0x172   :  { %v2035_v36 = vpop.f32.mrf.mxu2  ;;  %v2024_v18 = vpop.f32.mrf.mxu1 }
 0x173   :  { %v2036_v12 = vadd.f32 %v2035_v36, %v2023_v11 }
 0x174   :  { %v2048_v13 = vpop.f32.mrf.mxu3 }
 0x175   :  { %v2049_v16 = vadd.f32 %v2048_v13, %v2036_v12 }
 0x177   :  { %v2161_v19 = vmax.f32 %v2049_v16, 0.0 }
 0x179   :  { %v2169_v21 = vpack.c.bf16 %v2161_v19, %v2161_v19 }
 0x17a   :  { %v2037_v23 = vpop.f32.mrf.mxu2 }
 0x17b   :  { %2630 = vmatmul.bf16.vlgmr.msrb.gmra.mxu1 %v2169_v21 }
 0x17c   :  { %v2050_v24 = vpop.f32.mrf.mxu3 }
 0x188   :  { %v2061_v40 = vpop.f32.mrf.mxu0 }
 0x189   :  { %v2062_v33 = vadd.f32 %v2061_v40, %v458_v28 }
 0x18a   :  { %v2074_v34 = vpop.f32.mrf.mxu1 }
 0x18b   :  { %v2075_v7 = vadd.f32 %v2074_v34, %v2062_v33 }
 0x190   :  { %v2063_v42 = vpop.f32.mrf.mxu0 }
 0x192   :  { %v2087_v35 = vpop.f32.mrf.mxu2  ;;  %v2076_v43 = vpop.f32.mrf.mxu1 }
 0x193   :  { %v2088_v38 = vadd.f32 %v2087_v35, %v2075_v7 }
 0x194   :  { %v2100_v39 = vpop.f32.mrf.mxu3 }
 0x195   :  { %v2101_v41 = vadd.f32 %v2100_v39, %v2088_v38 }
 0x197   :  { %v2162_v45 = vmax.f32 %v2101_v41, 0.0 }
 0x199   :  { %v2170_v46 = vpack.c.bf16 %v2162_v45, %v2162_v45 }
 0x19a   :  { %v2089_v47 = vpop.f32.mrf.mxu2 }
 0x19b   :  { %2643 = vmatmul.bf16.vlgmr.msrb.gmra.mxu2 %v2170_v46 }
 0x19c   :  { %v2102_v48 = vpop.f32.mrf.mxu3 }
 0x1a8   :  { %v2113_v25 = vpop.f32.mrf.mxu0 }
 0x1a9   :  { %v2114_v8 = vadd.f32 %v2113_v25, %v459_v9 }
 0x1aa   :  { %v2126_v51 = vpop.f32.mrf.mxu1 }
 0x1ab   :  { %v2127_v15 = vadd.f32 %v2126_v51, %v2114_v8 }
 0x1b0   :  { %v2115_v56 = vpop.f32.mrf.mxu0 }
 0x1b2   :  { %v2139_v52 = vpop.f32.mrf.mxu2  ;;  %v2128_v57 = vpop.f32.mrf.mxu1 }
 0x1b3   :  { %v2140_v54 = vadd.f32 %v2139_v52, %v2127_v15 }
 0x1b4   :  { %v2152_v53 = vpop.f32.mrf.mxu3 }
 0x1b5   :  { %v2153_v58 = vadd.f32 %v2152_v53, %v2140_v54 }
 0x1b7   :  { %v2163_v59 = vmax.f32 %v2153_v58, 0.0 }
 0x1b9   :  { %v2171_v60 = vpack.c.bf16 %v2163_v59, %v2163_v59 }
 0x1ba   :  { %v2141_v61 = vpop.f32.mrf.mxu2 }
 0x1bb   :  { %2656 = vmatmul.bf16.vlgmr.msrb.gmra.mxu3 %v2171_v60 }
 0x1bc   :  { %v2154_v62 = vpop.f32.mrf.mxu3 }
 0x1c9   :  { %v2566_v2 = vpop.f32.mrf.mxu0 }
 0x1ca   :  { %v2567_v29 = vadd.f32 %v2566_v2, %v2172_v1  ;;  %v2579_v3 = vpop.f32.mrf.mxu1 }
 0x1cc   :  { %v2580_v4 = vadd.f32 %v2579_v3, %v2567_v29 }
 0x1d1   :  { %v2568_v6 = vpop.f32.mrf.mxu0 }
 0x1d2   :  { %v2592_v5 = vpop.f32.mrf.mxu2  ;;  %v2581_v11 = vpop.f32.mrf.mxu1 }
 0x1d3   :  { %v2593_v10 = vadd.f32 %v2592_v5, %v2580_v4 }
 0x1d4   :  { %v2605_v36 = vpop.f32.mrf.mxu3 }
 0x1d5   :  { %v2606_v12 = vadd.f32 %v2605_v36, %v2593_v10 }
 0x1da   :  { %v2594_v13 = vpop.f32.mrf.mxu2 }
 0x1dc   :  { %v2607_v14 = vpop.f32.mrf.mxu3 }
 0x1e9   :  { %v2618_v16 = vpop.f32.mrf.mxu0 }
 0x1ea   :  { %v2619_v17 = vadd.f32 %v2618_v16, %v2606_v12 }
 0x1f1   :  { %v2620_v18 = vpop.f32.mrf.mxu0 }
 0x1f8   :  { %v2631_v19 = vpop.f32.mrf.mxu1 }
 0x1f9   :  { %v2632_v22 = vadd.f32 %v2631_v19, %v2619_v17 }
 0x200   :  { %v2633_v50 = vpop.f32.mrf.mxu1 }
 0x21e   :  { %v2644_v20 = vpop.f32.mrf.mxu2 }
 0x21f   :  { %v2645_v23 = vadd.f32 %v2644_v20, %v2632_v22 }
 0x226   :  { %v2646_v21 = vpop.f32.mrf.mxu2 }
 0x23e   :  { %v2657_v24 = vpop.f32.mrf.mxu3 }
 0x23f   :  { %v2658_v26 = vadd.f32 %v2657_v24, %v2645_v23 }
 0x241   :  { %2661 = vst [vmem:[%s4442_s3] sm:$0xff] %v2658_v26 }
 0x246   :  { %v2659_v30 = vpop.f32.mrf.mxu3 }
 0x247   :  { %2666 = vsyncpa [#allocation3], 1 }
 0x248   :  { %2667 = vsyncpa [#allocation5], 1 }

</bundles_post_ra>
